<compile_context>
chip_gen: v7x
topology: tpu7x:2x2x1
jax: 0.10.0
libtpu: 0.0.40
codegen_flags: <defaults>
</compile_context>

<pallas_src>
import functools

import jax
import jax.numpy as jnp
from jax.experimental import pallas as pl
from jax.experimental.pallas import tpu as pltpu

W_ALIGN = 16   # bf16 sublane tile is (16, 128): keep weight segments 16-aligned
V_ALIGN = 8    # f32 sublane tile is (8, 128)


def _round_up(x, m):
    return (x + m - 1) // m * m


def _pick_tile(hw, target):
    """Largest multiple of 128 that divides hw (hw is a multiple of 128) and
    is <= target."""
    best = 128
    t = 128
    while t <= min(hw, target):
        if hw % t == 0:
            best = t
        t += 128
    return best


def _pack_rows(named, n_cols, row_align, dtype):
    """Stack (name, (rows, n_cols)) matrices with row_align-aligned offsets."""
    seg, total = {}, 0
    for name, mat in named:
        seg[name] = total
        total += _round_up(mat.shape[0], row_align)
    packed = jnp.zeros((total, n_cols), jnp.float32)
    for name, mat in named:
        packed = packed.at[seg[name]:seg[name] + mat.shape[0], :].set(
            mat.astype(jnp.float32))
    return packed.astype(dtype), seg


# ---------------------------------------------------------------------------
# Pallas kernel: fused Full_Graph forward over a (D, TM) pixel tile.
# Layout: channels on sublanes, pixels on lanes (lane-dense at TM % 128 == 0).
# ---------------------------------------------------------------------------
def full_graph_kernel(f0_ref, f1_ref, h0_ref, h1_ref, h2_ref,   # acts (1, D, TM)
                      w_ref, v_ref,                             # packed params
                      node0_ref, node1_ref, att_ref,            # outputs
                      *, d, seg_w, seg_v):
    f32 = jnp.float32
    bf16 = jnp.bfloat16

    def mm(name, nrows, x_f32):
        # bf16 x bf16 -> f32 MXU matmul on a 16-aligned weight segment.
        o = seg_w[name]
        r = _round_up(nrows, W_ALIGN)
        y = jnp.dot(w_ref[o:o + r, :], x_f32.astype(bf16),
                    preferred_element_type=f32)
        return y if r == nrows else y[:nrows, :]

    def vec(name, nrows):
        o = seg_v[name]
        return v_ref[o:o + nrows, :]        # (nrows, 1) -> broadcasts over lanes

    # -------- branch i == 0 : ConvGRU_0(input=h0, h_cur=f0) ------------------
    # Only f0 / h0 are live here (keeps vreg pressure low before node0 store).
    f0 = f0_ref[0].astype(f32)              # (D, TM)
    h0 = h0_ref[0].astype(f32)
    y0 = mm("c0g0_in", d + 2, h0)           # fused [c0_in; g0_in] @ h0
    g0 = y0[d:d + 2, :] + mm("g0_h", 2, f0) + vec("b_g0", 2)      # (2, TM)
    r0 = jax.nn.sigmoid(g0[0:1, :])
    u0 = jax.nn.sigmoid(g0[1:2, :])
    c0 = jnp.tanh(y0[0:d, :] + mm("c0_h", d, r0 * f0))            # (D, TM)
    node0_ref[0] = ((1.0 - u0) * f0 + u0 * c0).astype(node0_ref.dtype)

    # -------- Composition: comp_att + relation -------------------------------
    h1 = h1_ref[0].astype(f32)
    h2 = h2_ref[0].astype(f32)
    att = jax.nn.sigmoid(mm("att1", 1, h1) + mm("att2", 1, h2) + vec("b_att", 1))
    att_ref[0] = att.astype(att_ref.dtype)                        # (1, TM)

    f1 = f1_ref[0].astype(f32)
    y1 = mm("relf_g1h", d + 2, f1)          # fused [rel_f; g1_h] @ f1
    weighted = (h1 + h2) * att                                    # (D, TM)
    rel = y1[0:d, :] + mm("rel_w", d, weighted) + vec("bn_shift", d)
    comp_msg = jnp.maximum(rel, 0.0)

    # -------- branch i == 1 : ConvGRU_1(input=comp_msg, h_cur=f1) ------------
    y2 = mm("c1g1_in", d + 2, comp_msg)     # fused [c1_in; g1_in] @ comp_msg
    g1 = y2[d:d + 2, :] + y1[d:d + 2, :] + vec("b_g1", 2)
    r1 = jax.nn.sigmoid(g1[0:1, :])
    u1 = jax.nn.sigmoid(g1[1:2, :])
    c1 = jnp.tanh(y2[0:d, :] + mm("c1_h", d, r1 * f1))
    node1_ref[0] = ((1.0 - u1) * f1 + u1 * c1).astype(node1_ref.dtype)


# ---------------------------------------------------------------------------
# Parameter packing (PyTorch-shaped params -> packed bf16 weights + f32 biases)
# ---------------------------------------------------------------------------
def pack_params(params, d):
    (w_att, b_att, w_rel, gamma, beta, mean, var, eps,
     w_g0, b_g0, w_c0, w_g1, b_g1, w_c1) = params

    scale = gamma / jnp.sqrt(var + eps)          # inference-mode BN
    shift = beta - mean * scale
    w_rel_s = w_rel * scale[:, None]             # fold BN scale into conv rows

    def halves(w):                               # (Cout, 2D) -> (input, hidden)
        return w[:, :d], w[:, d:]

    g0_in, g0_h = halves(w_g0)
    c0_in, c0_h = halves(w_c0)
    a1, a2 = halves(w_att)
    rf, rw = halves(w_rel_s)
    g1_in, g1_h = halves(w_g1)
    c1_in, c1_h = halves(w_c1)

    # Fuse dots that share a RHS activation into one taller weight segment.
    w_pack, seg_w = _pack_rows(
        [("c0g0_in", jnp.concatenate([c0_in, g0_in], axis=0)),
         ("g0_h", g0_h), ("c0_h", c0_h),
         ("att1", a1), ("att2", a2),
         ("relf_g1h", jnp.concatenate([rf, g1_h], axis=0)),
         ("rel_w", rw),
         ("c1g1_in", jnp.concatenate([c1_in, g1_in], axis=0)),
         ("c1_h", c1_h)],
        d, W_ALIGN, jnp.bfloat16)
    v_pack, seg_v = _pack_rows(
        [("bn_shift", shift[:, None]), ("b_att", b_att[:, None]),
         ("b_g0", b_g0[:, None]), ("b_g1", b_g1[:, None])],
        1, V_ALIGN, jnp.float32)
    return w_pack, v_pack, seg_w, seg_v


# ---------------------------------------------------------------------------
# Wrapper
# ---------------------------------------------------------------------------
def full_graph_pallas(f_node_list, h_node_list, params, *, tile_target=1024):
    """f_node_list: [f0, f1] NCHW; h_node_list: [h0, h1, h2] NCHW.
    (p_node_list, xf, h_node_att_list are unused by Full_Graph.forward.)"""
    f0, f1 = f_node_list
    h0, h1, h2 = h_node_list
    B, D, H, W = f0.shape
    HW = H * W
    dtype = f0.dtype

    # channels-on-sublanes / pixels-on-lanes: NCHW -> (B, C, H*W), free reshape.
    # No dtype cast here: the kernel reads producer dtype and downcasts to bf16
    # only for the MXU operands.
    acts = [x.reshape(B, D, HW) for x in (f0, f1, h0, h1, h2)]

    HW_pad = _round_up(HW, 128)
    if HW_pad != HW:
        # Keep the out_spec lane-dense (unmasked vst) when H*W % 128 != 0.
        acts = [jnp.pad(x, ((0, 0), (0, 0), (0, HW_pad - HW))) for x in acts]

    TM = _pick_tile(HW_pad, tile_target)
    if B * (HW_pad // TM) < 2 and HW_pad // 128 >= 2:
        # Keep >= 2 grid steps so both v7x TensorCores get work when B == 1.
        TM = _pick_tile(HW_pad, HW_pad // 2)
    grid = (B, HW_pad // TM)

    w_pack, v_pack, seg_w, seg_v = pack_params(params, D)

    act_spec = pl.BlockSpec((1, D, TM), lambda b, i: (b, 0, i))
    att_spec = pl.BlockSpec((1, 1, TM), lambda b, i: (b, 0, i))
    w_spec = pl.BlockSpec(w_pack.shape, lambda b, i: (0, 0))
    v_spec = pl.BlockSpec(v_pack.shape, lambda b, i: (0, 0))

    out_shape = [
        jax.ShapeDtypeStruct((B, D, HW_pad), dtype),
        jax.ShapeDtypeStruct((B, D, HW_pad), dtype),
        jax.ShapeDtypeStruct((B, 1, HW_pad), dtype),
    ]

    # Roofline hint: this op is memory-bound (~10 flops/byte at f32 ingest).
    M_px = B * HW_pad
    act_bytes = jnp.dtype(dtype).itemsize
    cost = pl.CostEstimate(
        flops=int(2 * D * (6 * D + 10) * M_px),
        transcendentals=int((2 * D + 5) * M_px),
        bytes_accessed=int((7 * D + 1) * act_bytes * M_px
                           + 2 * int(w_pack.size) + 4 * int(v_pack.size)),
    )

    kernel = functools.partial(full_graph_kernel, d=D, seg_w=seg_w, seg_v=seg_v)

    node0, node1, att = pl.pallas_call(
        kernel,
        out_shape=out_shape,
        grid_spec=pltpu.PrefetchScalarGridSpec(
            num_scalar_prefetch=0,
            grid=grid,
            in_specs=[act_spec] * 5 + [w_spec, v_spec],
            out_specs=[act_spec, act_spec, att_spec],
        ),
        compiler_params=pltpu.CompilerParams(
            dimension_semantics=("parallel", "parallel")),
        cost_estimate=cost,
    )(*acts, w_pack, v_pack)

    if HW_pad != HW:
        node0 = node0[:, :, :HW]
        node1 = node1[:, :, :HW]
        att = att[:, :, :HW]

    f_node_list_new = [node0.reshape(B, D, H, W), node1.reshape(B, D, H, W)]
    comp_f_att = att.reshape(B, 1, H, W)
    return f_node_list_new, comp_f_att


# ---------------------------------------------------------------------------
# Pure-JAX reference (same math, no Pallas) for the correctness check.
# ---------------------------------------------------------------------------
def full_graph_ref(f_node_list, h_node_list, params):
    f0, f1 = f_node_list
    h0, h1, h2 = h_node_list
    (w_att, b_att, w_rel, gamma, beta, mean, var, eps,
     w_g0, b_g0, w_c0, w_g1, b_g1, w_c1) = params

    def conv1x1(w, b, x):                     # w (Cout, Cin), x (B, Cin, H, W)
        y = jnp.einsum("oi,bihw->bohw", w, x)
        if b is not None:
            y = y + b[None, :, None, None]
        return y

    def gru(wg, bg, wc, inp, h):
        g = conv1x1(wg, bg, jnp.concatenate([inp, h], axis=1))
        r = jax.nn.sigmoid(g[:, 0:1])
        u = jax.nn.sigmoid(g[:, 1:2])
        c = jnp.tanh(conv1x1(wc, None, jnp.concatenate([inp, r * h], axis=1)))
        return (1.0 - u) * h + u * c

    node0 = gru(w_g0, b_g0, w_c0, h0, f0)
    att = jax.nn.sigmoid(conv1x1(w_att, b_att, jnp.concatenate([h1, h2], axis=1)))
    rel = conv1x1(w_rel, None, jnp.concatenate([f1, (h1 + h2) * att], axis=1))
    scale = gamma / jnp.sqrt(var + eps)
    shift = beta - mean * scale
    msg = jnp.maximum(rel * scale[None, :, None, None]
                      + shift[None, :, None, None], 0.0)
    node1 = gru(w_g1, b_g1, w_c1, msg, f1)
    return [node0, node1], att


# ---------------------------------------------------------------------------
# Deterministic parameters matching the module shapes (PyTorch conventions).
# ---------------------------------------------------------------------------
def make_params(key, D):
    ks = jax.random.split(key, 10)
    s = 0.3
    w_att = s * jax.random.normal(ks[0], (1, 2 * D), jnp.float32)     # comp_att conv
    b_att = jnp.zeros((1,), jnp.float32)
    w_rel = s * jax.random.normal(ks[1], (D, 2 * D), jnp.float32)     # relation conv
    gamma = 1.0 + 0.1 * jax.random.normal(ks[2], (D,), jnp.float32)   # BN (inference)
    beta = 0.1 * jax.random.normal(ks[3], (D,), jnp.float32)
    mean = 0.05 * jax.random.normal(ks[4], (D,), jnp.float32)
    var = 1.0 + 0.1 * jnp.abs(jax.random.normal(ks[5], (D,), jnp.float32))
    eps = 1e-5
    w_g0 = s * jax.random.normal(ks[6], (2, 2 * D), jnp.float32)      # ConvGRU[0]
    b_g0 = jnp.zeros((2,), jnp.float32)
    w_c0 = s * jax.random.normal(ks[7], (D, 2 * D), jnp.float32)
    w_g1 = s * jax.random.normal(ks[8], (2, 2 * D), jnp.float32)      # ConvGRU[1]
    b_g1 = jnp.zeros((2,), jnp.float32)
    w_c1 = s * jax.random.normal(ks[9], (D, 2 * D), jnp.float32)
    return (w_att, b_att, w_rel, gamma, beta, mean, var, eps,
            w_g0, b_g0, w_c0, w_g1, b_g1, w_c1)


if __name__ == "__main__":
    # Module defaults: hidden_dim=10, cls_f=2 f-nodes, cls_h=3 h-nodes.
    B, D, H, W = 2, 10, 32, 32           # HW=1024 -> TM=1024 -> grid (2, 1)
    key = jax.random.PRNGKey(0)
    kf, kh, kp = jax.random.split(key, 3)

    f_node_list = [jax.random.normal(jax.random.fold_in(kf, i), (B, D, H, W),
                                     jnp.float32) for i in range(2)]
    h_node_list = [jax.random.normal(jax.random.fold_in(kh, i), (B, D, H, W),
                                     jnp.float32) for i in range(3)]
    params = make_params(kp, D)

    (node0, node1), comp_f_att = full_graph_pallas(f_node_list, h_node_list, params)
    jax.block_until_ready((node0, node1, comp_f_att))

    (r_node0, r_node1), r_att = full_graph_ref(f_node_list, h_node_list, params)
    assert node0.shape == (B, D, H, W) and comp_f_att.shape == (B, 1, H, W)
    # bf16 MXU operands inside the kernel -> compare with bf16-level tolerance.
    assert jnp.allclose(node0, r_node0, atol=3e-2, rtol=3e-2)
    assert jnp.allclose(node1, r_node1, atol=3e-2, rtol=3e-2)
    assert jnp.allclose(comp_f_att, r_att, atol=3e-2, rtol=3e-2)

    print("KERNEL_OK")
</pallas_src>

<mosaic_0001>
module attributes {stable_mosaic.version = 11 : i64} {
  func.func @full_graph_kernel(%arg0: i32, %arg1: i32, %arg2: memref<1x10x1024xf32, #tpu.memory_space<vmem>>, %arg3: memref<1x10x1024xf32, #tpu.memory_space<vmem>>, %arg4: memref<1x10x1024xf32, #tpu.memory_space<vmem>>, %arg5: memref<1x10x1024xf32, #tpu.memory_space<vmem>>, %arg6: memref<1x10x1024xf32, #tpu.memory_space<vmem>>, %arg7: memref<144x10xbf16, #tpu.memory_space<vmem>>, %arg8: memref<40x1xf32, #tpu.memory_space<vmem>>, %arg9: memref<1x10x1024xf32, #tpu.memory_space<vmem>>, %arg10: memref<1x10x1024xf32, #tpu.memory_space<vmem>>, %arg11: memref<1x1x1024xf32, #tpu.memory_space<vmem>>) attributes {dimension_semantics = [#tpu.dimension_semantics<parallel>, #tpu.dimension_semantics<parallel>], iteration_bounds = array<i64: 2, 1>, scalar_prefetch = 0 : i64, scratch_operands = 0 : i64, tpu.core_type = #tpu.core_type<tc>, window_params = [{transform_indices = @transform_0, window_bounds = array<i64: 1, 10, 1024>}, {transform_indices = @transform_1, window_bounds = array<i64: 1, 10, 1024>}, {transform_indices = @transform_2, window_bounds = array<i64: 1, 10, 1024>}, {transform_indices = @transform_3, window_bounds = array<i64: 1, 10, 1024>}, {transform_indices = @transform_4, window_bounds = array<i64: 1, 10, 1024>}, {pipeline_mode = #tpu.pipeline_mode<synchronous>, transform_indices = @transform_5, window_bounds = array<i64: 144, 10>}, {pipeline_mode = #tpu.pipeline_mode<synchronous>, transform_indices = @transform_6, window_bounds = array<i64: 40, 1>}, {transform_indices = @transform_7, window_bounds = array<i64: 1, 10, 1024>}, {transform_indices = @transform_8, window_bounds = array<i64: 1, 10, 1024>}, {transform_indices = @transform_9, window_bounds = array<i64: 1, 1, 1024>}]} {
    %c0 = arith.constant 0 : index
    %c0_0 = arith.constant 0 : index
    %c0_1 = arith.constant 0 : index
    %0 = vector.load %arg2[%c0, %c0_0, %c0_1] : memref<1x10x1024xf32, #tpu.memory_space<vmem>>, vector<1x10x1024xf32>
    %1 = vector.shape_cast %0 : vector<1x10x1024xf32> to vector<10x1024xf32>
    %c0_2 = arith.constant 0 : index
    %c0_3 = arith.constant 0 : index
    %c0_4 = arith.constant 0 : index
    %2 = vector.load %arg4[%c0_2, %c0_3, %c0_4] : memref<1x10x1024xf32, #tpu.memory_space<vmem>>, vector<1x10x1024xf32>
    %3 = vector.shape_cast %2 : vector<1x10x1024xf32> to vector<10x1024xf32>
    %c0_5 = arith.constant 0 : index
    %c0_6 = arith.constant 0 : index
    %4 = vector.load %arg7[%c0_5, %c0_6] : memref<144x10xbf16, #tpu.memory_space<vmem>>, vector<16x10xbf16>
    %5 = arith.truncf %3 : vector<10x1024xf32> to vector<10x1024xbf16>
    %cst = arith.constant dense<0.000000e+00> : vector<16x1024xf32>
    %6 = tpu.matmul %4, %5, %cst {dimension_numbers = #tpu.dot_dimension_numbers<[1], [0], [0], [1], [0, 0, 1, 1], [], []>} : vector<16x10xbf16>, vector<10x1024xbf16>, vector<16x1024xf32> -> vector<16x1024xf32>
    %7 = vector.extract_strided_slice %6 {offsets = [0, 0], sizes = [12, 1024], strides = [1, 1]} : vector<16x1024xf32> to vector<12x1024xf32>
    %8 = vector.extract_strided_slice %7 {offsets = [10, 0], sizes = [2, 1024], strides = [1, 1]} : vector<12x1024xf32> to vector<2x1024xf32>
    %c16 = arith.constant 16 : index
    %c0_7 = arith.constant 0 : index
    %9 = vector.load %arg7[%c16, %c0_7] : memref<144x10xbf16, #tpu.memory_space<vmem>>, vector<16x10xbf16>
    %10 = arith.truncf %1 : vector<10x1024xf32> to vector<10x1024xbf16>
    %cst_8 = arith.constant dense<0.000000e+00> : vector<16x1024xf32>
    %11 = tpu.matmul %9, %10, %cst_8 {dimension_numbers = #tpu.dot_dimension_numbers<[1], [0], [0], [1], [0, 0, 1, 1], [], []>} : vector<16x10xbf16>, vector<10x1024xbf16>, vector<16x1024xf32> -> vector<16x1024xf32>
    %12 = vector.extract_strided_slice %11 {offsets = [0, 0], sizes = [2, 1024], strides = [1, 1]} : vector<16x1024xf32> to vector<2x1024xf32>
    %13 = arith.addf %8, %12 : vector<2x1024xf32>
    %c24 = arith.constant 24 : index
    %c0_9 = arith.constant 0 : index
    %14 = vector.load %arg8[%c24, %c0_9] : memref<40x1xf32, #tpu.memory_space<vmem>>, vector<2x1xf32>
    %15 = vector.broadcast %14 : vector<2x1xf32> to vector<2x1024xf32>
    %16 = arith.addf %13, %15 : vector<2x1024xf32>
    %17 = vector.extract_strided_slice %16 {offsets = [0, 0], sizes = [1, 1024], strides = [1, 1]} : vector<2x1024xf32> to vector<1x1024xf32>
    %18 = arith.negf %17 : vector<1x1024xf32>
    %19 = math.exp %18 : vector<1x1024xf32>
    %cst_10 = arith.constant 1.000000e+00 : f32
    %20 = vector.broadcast %cst_10 : f32 to vector<1x1024xf32>
    %21 = arith.addf %20, %19 : vector<1x1024xf32>
    %22 = arith.divf %20, %21 : vector<1x1024xf32>
    %23 = vector.extract_strided_slice %16 {offsets = [1, 0], sizes = [1, 1024], strides = [1, 1]} : vector<2x1024xf32> to vector<1x1024xf32>
    %24 = arith.negf %23 : vector<1x1024xf32>
    %25 = math.exp %24 : vector<1x1024xf32>
    %cst_11 = arith.constant 1.000000e+00 : f32
    %26 = vector.broadcast %cst_11 : f32 to vector<1x1024xf32>
    %27 = arith.addf %26, %25 : vector<1x1024xf32>
    %28 = arith.divf %26, %27 : vector<1x1024xf32>
    %29 = vector.extract_strided_slice %7 {offsets = [0, 0], sizes = [10, 1024], strides = [1, 1]} : vector<12x1024xf32> to vector<10x1024xf32>
    %30 = vector.broadcast %22 : vector<1x1024xf32> to vector<10x1024xf32>
    %31 = arith.mulf %30, %1 : vector<10x1024xf32>
    %c32 = arith.constant 32 : index
    %c0_12 = arith.constant 0 : index
    %32 = vector.load %arg7[%c32, %c0_12] : memref<144x10xbf16, #tpu.memory_space<vmem>>, vector<16x10xbf16>
    %33 = arith.truncf %31 : vector<10x1024xf32> to vector<10x1024xbf16>
    %cst_13 = arith.constant dense<0.000000e+00> : vector<16x1024xf32>
    %34 = tpu.matmul %32, %33, %cst_13 {dimension_numbers = #tpu.dot_dimension_numbers<[1], [0], [0], [1], [0, 0, 1, 1], [], []>} : vector<16x10xbf16>, vector<10x1024xbf16>, vector<16x1024xf32> -> vector<16x1024xf32>
    %35 = vector.extract_strided_slice %34 {offsets = [0, 0], sizes = [10, 1024], strides = [1, 1]} : vector<16x1024xf32> to vector<10x1024xf32>
    %36 = arith.addf %29, %35 : vector<10x1024xf32>
    %37 = math.tanh %36 : vector<10x1024xf32>
    %cst_14 = arith.constant 1.000000e+00 : f32
    %38 = vector.broadcast %cst_14 : f32 to vector<1x1024xf32>
    %39 = arith.subf %38, %28 : vector<1x1024xf32>
    %40 = vector.broadcast %39 : vector<1x1024xf32> to vector<10x1024xf32>
    %41 = arith.mulf %40, %1 : vector<10x1024xf32>
    %42 = vector.broadcast %28 : vector<1x1024xf32> to vector<10x1024xf32>
    %43 = arith.mulf %42, %37 : vector<10x1024xf32>
    %44 = arith.addf %41, %43 : vector<10x1024xf32>
    %c0_15 = arith.constant 0 : index
    %c0_16 = arith.constant 0 : index
    %c0_17 = arith.constant 0 : index
    %45 = vector.load %arg9[%c0_15, %c0_16, %c0_17] : memref<1x10x1024xf32, #tpu.memory_space<vmem>>, vector<1x10x1024xf32>
    %46 = vector.shape_cast %45 : vector<1x10x1024xf32> to vector<10x1024xf32>
    %47 = vector.shape_cast %44 : vector<10x1024xf32> to vector<1x10x1024xf32>
    tpu.vector_store %arg9[%c0_15, %c0_16, %c0_17], %47 {strides = array<i32>} : memref<1x10x1024xf32, #tpu.memory_space<vmem>>, vector<1x10x1024xf32>,
    %c0_18 = arith.constant 0 : index
    %c0_19 = arith.constant 0 : index
    %c0_20 = arith.constant 0 : index
    %48 = vector.load %arg5[%c0_18, %c0_19, %c0_20] : memref<1x10x1024xf32, #tpu.memory_space<vmem>>, vector<1x10x1024xf32>
    %49 = vector.shape_cast %48 : vector<1x10x1024xf32> to vector<10x1024xf32>
    %c0_21 = arith.constant 0 : index
    %c0_22 = arith.constant 0 : index
    %c0_23 = arith.constant 0 : index
    %50 = vector.load %arg6[%c0_21, %c0_22, %c0_23] : memref<1x10x1024xf32, #tpu.memory_space<vmem>>, vector<1x10x1024xf32>
    %51 = vector.shape_cast %50 : vector<1x10x1024xf32> to vector<10x1024xf32>
    %c48 = arith.constant 48 : index
    %c0_24 = arith.constant 0 : index
    %52 = vector.load %arg7[%c48, %c0_24] : memref<144x10xbf16, #tpu.memory_space<vmem>>, vector<16x10xbf16>
    %53 = arith.truncf %49 : vector<10x1024xf32> to vector<10x1024xbf16>
    %cst_25 = arith.constant dense<0.000000e+00> : vector<16x1024xf32>
    %54 = tpu.matmul %52, %53, %cst_25 {dimension_numbers = #tpu.dot_dimension_numbers<[1], [0], [0], [1], [0, 0, 1, 1], [], []>} : vector<16x10xbf16>, vector<10x1024xbf16>, vector<16x1024xf32> -> vector<16x1024xf32>
    %55 = vector.extract_strided_slice %54 {offsets = [0, 0], sizes = [1, 1024], strides = [1, 1]} : vector<16x1024xf32> to vector<1x1024xf32>
    %c64 = arith.constant 64 : index
    %c0_26 = arith.constant 0 : index
    %56 = vector.load %arg7[%c64, %c0_26] : memref<144x10xbf16, #tpu.memory_space<vmem>>, vector<16x10xbf16>
    %57 = arith.truncf %51 : vector<10x1024xf32> to vector<10x1024xbf16>
    %cst_27 = arith.constant dense<0.000000e+00> : vector<16x1024xf32>
    %58 = tpu.matmul %56, %57, %cst_27 {dimension_numbers = #tpu.dot_dimension_numbers<[1], [0], [0], [1], [0, 0, 1, 1], [], []>} : vector<16x10xbf16>, vector<10x1024xbf16>, vector<16x1024xf32> -> vector<16x1024xf32>
    %59 = vector.extract_strided_slice %58 {offsets = [0, 0], sizes = [1, 1024], strides = [1, 1]} : vector<16x1024xf32> to vector<1x1024xf32>
    %60 = arith.addf %55, %59 : vector<1x1024xf32>
    %c16_28 = arith.constant 16 : index
    %c0_29 = arith.constant 0 : index
    %61 = vector.load %arg8[%c16_28, %c0_29] : memref<40x1xf32, #tpu.memory_space<vmem>>, vector<1x1xf32>
    %62 = vector.broadcast %61 : vector<1x1xf32> to vector<1x1024xf32>
    %63 = arith.addf %60, %62 : vector<1x1024xf32>
    %64 = arith.negf %63 : vector<1x1024xf32>
    %65 = math.exp %64 : vector<1x1024xf32>
    %cst_30 = arith.constant 1.000000e+00 : f32
    %66 = vector.broadcast %cst_30 : f32 to vector<1x1024xf32>
    %67 = arith.addf %66, %65 : vector<1x1024xf32>
    %68 = arith.divf %66, %67 : vector<1x1024xf32>
    %c0_31 = arith.constant 0 : index
    %c0_32 = arith.constant 0 : index
    %c0_33 = arith.constant 0 : index
    %69 = vector.load %arg11[%c0_31, %c0_32, %c0_33] : memref<1x1x1024xf32, #tpu.memory_space<vmem>>, vector<1x1x1024xf32>
    %70 = vector.shape_cast %69 : vector<1x1x1024xf32> to vector<1x1024xf32>
    %71 = vector.shape_cast %68 : vector<1x1024xf32> to vector<1x1x1024xf32>
    tpu.vector_store %arg11[%c0_31, %c0_32, %c0_33], %71 {strides = array<i32>} : memref<1x1x1024xf32, #tpu.memory_space<vmem>>, vector<1x1x1024xf32>,
    %c0_34 = arith.constant 0 : index
    %c0_35 = arith.constant 0 : index
    %c0_36 = arith.constant 0 : index
    %72 = vector.load %arg3[%c0_34, %c0_35, %c0_36] : memref<1x10x1024xf32, #tpu.memory_space<vmem>>, vector<1x10x1024xf32>
    %73 = vector.shape_cast %72 : vector<1x10x1024xf32> to vector<10x1024xf32>
    %c80 = arith.constant 80 : index
    %c0_37 = arith.constant 0 : index
    %74 = vector.load %arg7[%c80, %c0_37] : memref<144x10xbf16, #tpu.memory_space<vmem>>, vector<16x10xbf16>
    %75 = arith.truncf %73 : vector<10x1024xf32> to vector<10x1024xbf16>
    %cst_38 = arith.constant dense<0.000000e+00> : vector<16x1024xf32>
    %76 = tpu.matmul %74, %75, %cst_38 {dimension_numbers = #tpu.dot_dimension_numbers<[1], [0], [0], [1], [0, 0, 1, 1], [], []>} : vector<16x10xbf16>, vector<10x1024xbf16>, vector<16x1024xf32> -> vector<16x1024xf32>
    %77 = vector.extract_strided_slice %76 {offsets = [0, 0], sizes = [12, 1024], strides = [1, 1]} : vector<16x1024xf32> to vector<12x1024xf32>
    %78 = arith.addf %49, %51 : vector<10x1024xf32>
    %79 = vector.broadcast %68 : vector<1x1024xf32> to vector<10x1024xf32>
    %80 = arith.mulf %78, %79 : vector<10x1024xf32>
    %81 = vector.extract_strided_slice %77 {offsets = [0, 0], sizes = [10, 1024], strides = [1, 1]} : vector<12x1024xf32> to vector<10x1024xf32>
    %c96 = arith.constant 96 : index
    %c0_39 = arith.constant 0 : index
    %82 = vector.load %arg7[%c96, %c0_39] : memref<144x10xbf16, #tpu.memory_space<vmem>>, vector<16x10xbf16>
    %83 = arith.truncf %80 : vector<10x1024xf32> to vector<10x1024xbf16>
    %cst_40 = arith.constant dense<0.000000e+00> : vector<16x1024xf32>
    %84 = tpu.matmul %82, %83, %cst_40 {dimension_numbers = #tpu.dot_dimension_numbers<[1], [0], [0], [1], [0, 0, 1, 1], [], []>} : vector<16x10xbf16>, vector<10x1024xbf16>, vector<16x1024xf32> -> vector<16x1024xf32>
    %85 = vector.extract_strided_slice %84 {offsets = [0, 0], sizes = [10, 1024], strides = [1, 1]} : vector<16x1024xf32> to vector<10x1024xf32>
    %86 = arith.addf %81, %85 : vector<10x1024xf32>
    %c0_41 = arith.constant 0 : index
    %c0_42 = arith.constant 0 : index
    %87 = vector.load %arg8[%c0_41, %c0_42] : memref<40x1xf32, #tpu.memory_space<vmem>>, vector<10x1xf32>
    %88 = vector.broadcast %87 : vector<10x1xf32> to vector<10x1024xf32>
    %89 = arith.addf %86, %88 : vector<10x1024xf32>
    %cst_43 = arith.constant 0.000000e+00 : f32
    %90 = vector.broadcast %cst_43 : f32 to vector<10x1024xf32>
    %91 = arith.maximumf %89, %90 : vector<10x1024xf32>
    %c112 = arith.constant 112 : index
    %c0_44 = arith.constant 0 : index
    %92 = vector.load %arg7[%c112, %c0_44] : memref<144x10xbf16, #tpu.memory_space<vmem>>, vector<16x10xbf16>
    %93 = arith.truncf %91 : vector<10x1024xf32> to vector<10x1024xbf16>
    %cst_45 = arith.constant dense<0.000000e+00> : vector<16x1024xf32>
    %94 = tpu.matmul %92, %93, %cst_45 {dimension_numbers = #tpu.dot_dimension_numbers<[1], [0], [0], [1], [0, 0, 1, 1], [], []>} : vector<16x10xbf16>, vector<10x1024xbf16>, vector<16x1024xf32> -> vector<16x1024xf32>
    %95 = vector.extract_strided_slice %94 {offsets = [0, 0], sizes = [12, 1024], strides = [1, 1]} : vector<16x1024xf32> to vector<12x1024xf32>
    %96 = vector.extract_strided_slice %95 {offsets = [10, 0], sizes = [2, 1024], strides = [1, 1]} : vector<12x1024xf32> to vector<2x1024xf32>
    %97 = vector.extract_strided_slice %77 {offsets = [10, 0], sizes = [2, 1024], strides = [1, 1]} : vector<12x1024xf32> to vector<2x1024xf32>
    %98 = arith.addf %96, %97 : vector<2x1024xf32>
    %c32_46 = arith.constant 32 : index
    %c0_47 = arith.constant 0 : index
    %99 = vector.load %arg8[%c32_46, %c0_47] : memref<40x1xf32, #tpu.memory_space<vmem>>, vector<2x1xf32>
    %100 = vector.broadcast %99 : vector<2x1xf32> to vector<2x1024xf32>
    %101 = arith.addf %98, %100 : vector<2x1024xf32>
    %102 = vector.extract_strided_slice %101 {offsets = [0, 0], sizes = [1, 1024], strides = [1, 1]} : vector<2x1024xf32> to vector<1x1024xf32>
    %103 = arith.negf %102 : vector<1x1024xf32>
    %104 = math.exp %103 : vector<1x1024xf32>
    %cst_48 = arith.constant 1.000000e+00 : f32
    %105 = vector.broadcast %cst_48 : f32 to vector<1x1024xf32>
    %106 = arith.addf %105, %104 : vector<1x1024xf32>
    %107 = arith.divf %105, %106 : vector<1x1024xf32>
    %108 = vector.extract_strided_slice %101 {offsets = [1, 0], sizes = [1, 1024], strides = [1, 1]} : vector<2x1024xf32> to vector<1x1024xf32>
    %109 = arith.negf %108 : vector<1x1024xf32>
    %110 = math.exp %109 : vector<1x1024xf32>
    %cst_49 = arith.constant 1.000000e+00 : f32
    %111 = vector.broadcast %cst_49 : f32 to vector<1x1024xf32>
    %112 = arith.addf %111, %110 : vector<1x1024xf32>
    %113 = arith.divf %111, %112 : vector<1x1024xf32>
    %114 = vector.extract_strided_slice %95 {offsets = [0, 0], sizes = [10, 1024], strides = [1, 1]} : vector<12x1024xf32> to vector<10x1024xf32>
    %115 = vector.broadcast %107 : vector<1x1024xf32> to vector<10x1024xf32>
    %116 = arith.mulf %115, %73 : vector<10x1024xf32>
    %c128 = arith.constant 128 : index
    %c0_50 = arith.constant 0 : index
    %117 = vector.load %arg7[%c128, %c0_50] : memref<144x10xbf16, #tpu.memory_space<vmem>>, vector<16x10xbf16>
    %118 = arith.truncf %116 : vector<10x1024xf32> to vector<10x1024xbf16>
    %cst_51 = arith.constant dense<0.000000e+00> : vector<16x1024xf32>
    %119 = tpu.matmul %117, %118, %cst_51 {dimension_numbers = #tpu.dot_dimension_numbers<[1], [0], [0], [1], [0, 0, 1, 1], [], []>} : vector<16x10xbf16>, vector<10x1024xbf16>, vector<16x1024xf32> -> vector<16x1024xf32>
    %120 = vector.extract_strided_slice %119 {offsets = [0, 0], sizes = [10, 1024], strides = [1, 1]} : vector<16x1024xf32> to vector<10x1024xf32>
    %121 = arith.addf %114, %120 : vector<10x1024xf32>
    %122 = math.tanh %121 : vector<10x1024xf32>
    %cst_52 = arith.constant 1.000000e+00 : f32
    %123 = vector.broadcast %cst_52 : f32 to vector<1x1024xf32>
    %124 = arith.subf %123, %113 : vector<1x1024xf32>
    %125 = vector.broadcast %124 : vector<1x1024xf32> to vector<10x1024xf32>
    %126 = arith.mulf %125, %73 : vector<10x1024xf32>
    %127 = vector.broadcast %113 : vector<1x1024xf32> to vector<10x1024xf32>
    %128 = arith.mulf %127, %122 : vector<10x1024xf32>
    %129 = arith.addf %126, %128 : vector<10x1024xf32>
    %c0_53 = arith.constant 0 : index
    %c0_54 = arith.constant 0 : index
    %c0_55 = arith.constant 0 : index
    %130 = vector.load %arg10[%c0_53, %c0_54, %c0_55] : memref<1x10x1024xf32, #tpu.memory_space<vmem>>, vector<1x10x1024xf32>
    %131 = vector.shape_cast %130 : vector<1x10x1024xf32> to vector<10x1024xf32>
    %132 = vector.shape_cast %129 : vector<10x1024xf32> to vector<1x10x1024xf32>
    tpu.vector_store %arg10[%c0_53, %c0_54, %c0_55], %132 {strides = array<i32>} : memref<1x10x1024xf32, #tpu.memory_space<vmem>>, vector<1x10x1024xf32>,
    return
  }
  func.func @transform_0(%arg0: i32, %arg1: i32) -> (i32, i32, i32) {
    %c0_i32 = arith.constant 0 : i32
    %c0_i32_0 = arith.constant 0 : i32
    return %arg0, %c0_i32, %arg1 : i32, i32, i32
  }
  func.func @transform_1(%arg0: i32, %arg1: i32) -> (i32, i32, i32) {
    %c0_i32 = arith.constant 0 : i32
    %c0_i32_0 = arith.constant 0 : i32
    return %arg0, %c0_i32, %arg1 : i32, i32, i32
  }
  func.func @transform_2(%arg0: i32, %arg1: i32) -> (i32, i32, i32) {
    %c0_i32 = arith.constant 0 : i32
    %c0_i32_0 = arith.constant 0 : i32
    return %arg0, %c0_i32, %arg1 : i32, i32, i32
  }
  func.func @transform_3(%arg0: i32, %arg1: i32) -> (i32, i32, i32) {
    %c0_i32 = arith.constant 0 : i32
    %c0_i32_0 = arith.constant 0 : i32
    return %arg0, %c0_i32, %arg1 : i32, i32, i32
  }
  func.func @transform_4(%arg0: i32, %arg1: i32) -> (i32, i32, i32) {
    %c0_i32 = arith.constant 0 : i32
    %c0_i32_0 = arith.constant 0 : i32
    return %arg0, %c0_i32, %arg1 : i32, i32, i32
  }
  func.func @transform_5(%arg0: i32, %arg1: i32) -> (i32, i32) {
    %c0_i32 = arith.constant 0 : i32
    %c0_i32_0 = arith.constant 0 : i32
    %c0_i32_1 = arith.constant 0 : i32
    return %c0_i32, %c0_i32_0 : i32, i32
  }
  func.func @transform_6(%arg0: i32, %arg1: i32) -> (i32, i32) {
    %c0_i32 = arith.constant 0 : i32
    %c0_i32_0 = arith.constant 0 : i32
    %c0_i32_1 = arith.constant 0 : i32
    return %c0_i32, %c0_i32_0 : i32, i32
  }
  func.func @transform_7(%arg0: i32, %arg1: i32) -> (i32, i32, i32) {
    %c0_i32 = arith.constant 0 : i32
    %c0_i32_0 = arith.constant 0 : i32
    return %arg0, %c0_i32, %arg1 : i32, i32, i32
  }
  func.func @transform_8(%arg0: i32, %arg1: i32) -> (i32, i32, i32) {
    %c0_i32 = arith.constant 0 : i32
    %c0_i32_0 = arith.constant 0 : i32
    return %arg0, %c0_i32, %arg1 : i32, i32, i32
  }
  func.func @transform_9(%arg0: i32, %arg1: i32) -> (i32, i32, i32) {
    %c0_i32 = arith.constant 0 : i32
    %c0_i32_0 = arith.constant 0 : i32
    return %arg0, %c0_i32, %arg1 : i32, i32, i32
  }
}

</mosaic_0001>

<bundles_post_ra>
// kernel: tpu_custom_call.1
= control target key start
LH: loop header
LB: loop body
LE: loop exit
PB: predicated region body
PF: predicated region fallthrough
CT: control target
= control target key end

     0   :  { %s5308_s0 = inlined_call_operand.vmem [shape: f32[2,10,1024], index: 0, kind: input, shape index: {}]   ;;  %s5309_s1 = inlined_call_operand.vmem [shape: f32[2,10,1024], index: 1, kind: input, shape index: {}]   ;;  %s5310_s2 = inlined_call_operand.vmem [shape: f32[2,10,1024], index: 2, kind: input, shape index: {}]   ;;  %s5311_s3 = inlined_call_operand.vmem [shape: f32[2,10,1024], index: 3, kind: input, shape index: {}]   ;;  %s5312_s4 = inlined_call_operand.vmem [shape: f32[2,10,1024], index: 4, kind: input, shape index: {}]   ;;  %s5313_s5 = inlined_call_operand.vmem [shape: bf16[144,10], index: 5, kind: input, shape index: {}]   ;;  %s5314_s6 = inlined_call_operand.vmem [shape: f32[40,1], index: 6, kind: input, shape index: {}]   ;;  %s5315_s7 = inlined_call_operand.vmem [shape: f32[2,10,1024], index: 7, kind: output, shape index: {0}]   ;;  %s5316_s8 = inlined_call_operand.vmem [shape: f32[2,10,1024], index: 8, kind: output, shape index: {1}]   ;;  %s5317_s9 = inlined_call_operand.hbm [shape: f32[2,1,1024], index: 9, kind: output, shape index: {2}]  }
   0x1   :  { %5340 = sst [smem:[#allocation48_spill]] %s5308_s0 }
   0x2   :  { %5341 = sst [smem:[#allocation49_spill]] %s5309_s1 }
   0x3   :  { %5342 = sst [smem:[#allocation50_spill]] %s5310_s2 }
   0x4   :  { %15 = vsyncpa [#allocation3], 0 }
   0x5   :  { %17 = vsyncpa [#allocation3 + $0x1], 0  ;;  %s4171_s30 = smov 0   ;;  %s4173_s10 = smov 0  }
   0x6   :  { %s4175_s11 = smov 0   ;;  %s4177_s12 = smov 0  }
   0x7   :  { %s4179_s13 = smov 0   ;;  %s4181_s14 = smov 0  }
   0x8 LB: > { %s3654_s15 = sadd.s32 4294967295, %s4116_s14   ;;  %s3655_s16 = sadd.s32 4294967294, %s4116_s14   ;;  %s4116_s14 = sphi %s4181_s14, %s23_s14   ;;  %s4112_s13 = sphi %s4179_s13, %s5439_s13   ;;  %s4108_s12 = sphi %s4177_s12, %s5438_s12   ;;  %s4104_s11 = sphi %s4175_s11, %s5437_s11   ;;  %s4100_s10 = sphi %s4173_s10, %s5436_s10   ;;  %s4096_s30 = sphi %s4171_s30, %s5435_s30  }
   0x9   : > { %s35_s17 = sadd.s32 1, %s4112_s13  ;;  %s282_s18 = sadd.s32 1, %s4104_s11 }
   0xa   : > { %p37_p0 = scmp.ge.s32.totalorder %s35_s17, 2  ;;  %p292_p1 = scmp.ne.s32.totalorder %s4104_s11, %s4100_s10 }
   0xb   : > { %p293_p2 = scmp.eq.s32.totalorder %s3654_s15, 1  ;;  %p298_p3 = scmp.ne.s32.totalorder %s4100_s10, %s4096_s30 }
   0xc   : > { %s5441_s17 = smov (%p37_p0, %s35_s17), 0  ;;  %p299_p5 = scmp.eq.s32.totalorder %s3655_s16, 1 }
   0xd   : > { %p4211_p4 = por %p293_p2, %p292_p1  ;;  %s277_s20 = ssub.s32 %s4112_s13, %s5441_s17 }
   0xe   : > { %p3658_p6 = scmp.ge.s32.totalorder %s4116_s14, 1  ;;  %p280_p7 = scmp.eq.s32.totalorder %s277_s20, 0 }
   0xf   : > { %p4218_p8 = por %p299_p5, %p298_p3  ;;  %p388_p9 = scmp.lt.s32.totalorder %s4116_s14, 3 }
  0x10   : > { %s4224_s22 = scalar_select %p280_p7, %s4104_s11, %s282_s18  }
  0x11   : > { %p389_p10 = pnand %p3658_p6, %p388_p9 }
  0x13   : > { %392 = sbr.rel (%p389_p10) target bundleno = 1331 (0x533), region = 48 }
  0x1a   : > { %p483_p11 = scmp.lt.s32.totalorder %s4108_s12, 1  ;;  %v5318_v0 = vmov 0   ;;  %v1040_v1 = vld [vmem:[%s5314_s6 + $0x18] sm:$0x3]  ;;  %v1985_v2 = vld [vmem:[%s5314_s6 + $0x10] sm:$0x1] }
  0x1b   : > { %662 = vmatprep.mubr.bf16.mxu0 %v5318_v0  ;;  %705 = vmatprep.mubr.bf16.mxu1 %v5318_v0  ;;  %s5345_s2 = sld [smem:[#allocation50_spill]]  ;;  %vm605_vm0 = vcmask 1044480   ;;  %v2896_v6 = vld [vmem:[%s5314_s6 + $0x20] sm:$0x3]  ;;  %s5346_s0 = sld [smem:[#allocation48_spill]]  ;;  %vm601_vm1 = vcmask 80896  }
  0x1c   : > { %s484_s23 = scalar_select %p483_p11, %s4108_s12, 1  ;;  %3849 = vset.pattern.permute.xlu0 %v5318_v0  ;;  %3850 = vset.pattern.permute.xlu1 %v5318_v0  ;;  %v3851_v15 = vld [vmem:[%s5313_s5] sm:$0xff]   ;;  %v3852_v59 = vld [vmem:[%s5313_s5 + $0x8] sm:$0xff]  }
  0x1d   : > { %1043 = vperm.xlu0 %3849, %v1040_v1   ;;  %s5404_s1 = sld [smem:[#allocation49_spill]]  ;;  %s479_s15 = sand.u32 1, %s4100_s10  }
  0x1e   : > { %s4238_s28 = sshll.u32 %s484_s23, 7  ;;  %s3408_s24 = scalar_lea.sflag [#allocation3], %s479_s15 }
  0x1f   : > { %s4377_s20 = scalar_lea.vmem %s5311_s3, %s4238_s28  ;;  %s4398_s25 = scalar_lea.vmem %s5312_s4, %s4238_s28 }
  0x20   : > { %v4380_v62 = vld [vmem:[%s4377_s20 + $0x8] sm:$0xff]  ;;  %v4386_v1 = vld [vmem:[%s4377_s20 + $0x18] sm:$0xff]  ;;  %s4832_s26 = scalar_lea.vmem %s5315_s7, %s4238_s28 }
  0x21   : > { %s4244_s16 = scalar_lea.vmem %s5345_s2, %s4238_s28  ;;  %1988 = vperm.xlu0 %3849, %v1985_v2   ;;  %s4265_s27 = scalar_lea.vmem %s5346_s0, %s4238_s28  ;;  %v4383_v63 = vld [vmem:[%s4377_s20 + $0x48] sm:$0x3]  ;;  %v4389_v2 = vld [vmem:[%s4377_s20 + $0x58] sm:$0x3] }
  0x22   : > { %v571_v3 = vld [vmem:[%s4244_s16 + $0x8] sm:$0xff]  ;;  %v573_v5 = vld [vmem:[%s4244_s16 + $0x18] sm:$0xff]  ;;  %v570_v9 = vld [vmem:[%s4244_s16] sm:$0xff]  ;;  %s4120_s0 = smov [#allocation2]  }
  0x23   : > { %v579_v4 = vld [vmem:[%s4244_s16 + $0x48] sm:$0x3]  ;;  %v581_v8 = vld [vmem:[%s4244_s16 + $0x58] sm:$0x3]  ;;  %v578_v10 = vld [vmem:[%s4244_s16 + $0x40] sm:$0x3] }
  0x24   : > { %v589_v7 = vpack.c.bf16 %v579_v4, %v571_v3  ;;  %v591_v11 = vpack.c.bf16 %v581_v8, %v573_v5  ;;  %v588_v12 = vpack.c.bf16 %v578_v10, %v570_v9  ;;  %v572_v13 = vld [vmem:[%s4244_s16 + $0x10] sm:$0xff]  ;;  %v575_v16 = vld [vmem:[%s4244_s16 + $0x28] sm:$0xff]  ;;  %v577_v19 = vld [vmem:[%s4244_s16 + $0x38] sm:$0xff] }
  0x25   : > { %v580_v14 = vld [vmem:[%s4244_s16 + $0x50] sm:$0x3]  ;;  %v583_v18 = vld [vmem:[%s4244_s16 + $0x68] sm:$0x3]  ;;  %v585_v20 = vld [vmem:[%s4244_s16 + $0x78] sm:$0x3]  ;;  %2899 = vperm.xlu0 %3849, %v2896_v6  }
  0x26   : > { %3675 = vmatprep.subr.msk.bf16.mxu0 %vm605_vm0, %v589_v7  ;;  %v590_v17 = vpack.c.bf16 %v580_v14, %v572_v13  ;;  %3677 = vmatprep.subr.msk.bf16.mxu1 %vm605_vm0, %v591_v11  ;;  %v607_v21 = vsel %vm605_vm0, %v588_v12, 0  ;;  %v593_v22 = vpack.c.bf16 %v583_v18, %v575_v16  ;;  %v595_v23 = vpack.c.bf16 %v585_v20, %v577_v19  ;;  %v574_v24 = vld [vmem:[%s4244_s16 + $0x20] sm:$0xff]  ;;  %v576_v26 = vld [vmem:[%s4244_s16 + $0x30] sm:$0xff]  ;;  %v4279_v30 = vld [vmem:[%s4265_s27 + $0x8] sm:$0xff] }
  0x27   : > { %v582_v25 = vld [vmem:[%s4244_s16 + $0x60] sm:$0x3]  ;;  %631 = vmatpush1.bf16.msra.mxu0 %v607_v21  ;;  %v584_v29 = vld [vmem:[%s4244_s16 + $0x70] sm:$0x3]  ;;  %v4282_v31 = vld [vmem:[%s4265_s27 + $0x48] sm:$0x3] }
  0x28   : > { %v613_v27 = vsel %vm605_vm0, %v590_v17, 0  ;;  %v592_v28 = vpack.c.bf16 %v582_v25, %v574_v24  ;;  %3679 = vmatprep.subr.msk.bf16.mxu0 %vm605_vm0, %v593_v22  ;;  %v594_v32 = vpack.c.bf16 %v584_v29, %v576_v26  ;;  %v4286_v33 = vld [vmem:[%s4265_s27 + $0x18] sm:$0xff]  ;;  %v805_v36 = vpack.c.bf16 %v4282_v31, %v4279_v30  ;;  %v4296_v37 = vld [vmem:[%s4265_s27] sm:$0xff]  ;;  %v4306_v41 = vld [vmem:[%s4265_s27 + $0x10] sm:$0xff]  ;;  %s4945_s16 = sshll.u32 %s479_s15, 3 }
  0x29   : > { %674 = vmatpush1.bf16.msra.mxu1 %v613_v27  ;;  %v4289_v34 = vld [vmem:[%s4265_s27 + $0x58] sm:$0x3]  ;;  %v4299_v38 = vld [vmem:[%s4265_s27 + $0x40] sm:$0x3]  ;;  %v4309_v42 = vld [vmem:[%s4265_s27 + $0x50] sm:$0x3] }
  0x2a   : > { %3681 = vmatprep.subr.msk.bf16.mxu1 %vm605_vm0, %v595_v23  ;;  %v619_v35 = vsel %vm605_vm0, %v592_v28, 0  ;;  %3676 = vmatmul.mubr.msk.bf16.vlgmr.msra.gmra.mrb[0].mxu0 %vm601_vm1, %v3851_v15  ;;  %v625_v39 = vsel %vm605_vm0, %v594_v32, 0  ;;  %v807_v40 = vpack.c.bf16 %v4289_v34, %v4286_v33  ;;  %v804_v43 = vpack.c.bf16 %v4299_v38, %v4296_v37  ;;  %v4316_v44 = vld [vmem:[%s4265_s27 + $0x28] sm:$0xff]  ;;  %v4327_v47 = vld [vmem:[%s4265_s27 + $0x38] sm:$0xff]  ;;  %v4337_v52 = vld [vmem:[%s4265_s27 + $0x20] sm:$0xff]  ;;  %s481_s18 = scalar_lea.vmem [#allocation2], %s4945_s16 }
  0x2b   : > { %717 = vmatpush1.bf16.msra.mxu0 %v619_v35  ;;  %748 = vmatprep.mubr.bf16.mxu0 %v5318_v0  ;;  %v4319_v45 = vld [vmem:[%s4265_s27 + $0x68] sm:$0x3]  ;;  %v806_v46 = vpack.c.bf16 %v4309_v42, %v4306_v41  ;;  %v4330_v48 = vld [vmem:[%s4265_s27 + $0x78] sm:$0x3]  ;;  %v4340_v53 = vld [vmem:[%s4265_s27 + $0x60] sm:$0x3] }
  0x2c   : > { %3678 = vmatmul.mubr.msk.bf16.vlgmr.msra.gmra.mrb[0].mxu1 %vm601_vm1, %v3851_v15  ;;  %3684 = vmatprep.subr.msk.bf16.mxu0 %vm605_vm0, %v805_v36  ;;  %v821_v49 = vsel %vm605_vm0, %v804_v43, 0  ;;  %v809_v51 = vpack.c.bf16 %v4319_v45, %v4316_v44  ;;  %5347 = vst [vmem:[#allocation5_spill] sm:$0xff] %v4340_v53  ;;  %v811_v54 = vpack.c.bf16 %v4330_v48, %v4327_v47  ;;  %v4346_v55 = vld [vmem:[%s4265_s27 + $0x30] sm:$0xff]  ;;  %v4392_v3 = vld [vmem:[%s4377_s20] sm:$0xff]  ;;  %v4407_v6 = vld [vmem:[%s4398_s25 + $0x8] sm:$0xff]  ;;  %s3432_s23 = sshll.u32 %s481_s18, 4  ;;  %s3433_s23 = int_to_ptr.vmem [resolvable:$true] %s3432_s23 }
  0x2d   : > { %760 = vmatpush1.bf16.msra.mxu1 %v625_v39  ;;  %791 = vmatprep.mubr.bf16.mxu1 %v5318_v0  ;;  %v827_v50 = vsel %vm605_vm0, %v806_v46, 0  ;;  %v4349_v56 = vld [vmem:[%s4265_s27 + $0x70] sm:$0x3]  ;;  %v808_v57 = vpack.c.bf16 %v4340_v53, %v4337_v52  ;;  %v4401_v4 = vld [vmem:[%s4377_s20 + $0x40] sm:$0x3]  ;;  %v4413_v8 = vld [vmem:[%s4398_s25 + $0x18] sm:$0xff]  ;;  %v4420_v10 = vadd.f32 %v4407_v6, %v4380_v62 }
  0x2e   : > { %3686 = vmatprep.subr.msk.bf16.mxu1 %vm605_vm0, %v807_v40  ;;  %v810_v58 = vpack.c.bf16 %v4349_v56, %v4346_v55  ;;  %v4404_v5 = vld [vmem:[%s4377_s20 + $0x10] sm:$0xff]  ;;  %v4410_v7 = vld [vmem:[%s4398_s25 + $0x48] sm:$0x3]  ;;  %v4427_v12 = vld [vmem:[%s4398_s25 + $0x58] sm:$0x3]  ;;  %v4431_v13 = vadd.f32 %v4413_v8, %v4386_v1 }
  0x2f   : > { %v833_v60 = vsel %vm605_vm0, %v808_v57, 0  ;;  %v4416_v9 = vld [vmem:[%s4377_s20 + $0x50] sm:$0x3]  ;;  %5348 = vst [vmem:[#allocation6_spill] sm:$0xff] %v4420_v10  ;;  %v4424_v11 = vadd.f32 %v4410_v7, %v4383_v63  ;;  %5350 = vst [vmem:[#allocation8_spill] sm:$0xff] %v4427_v12  ;;  %v4434_v14 = vld [vmem:[%s4398_s25] sm:$0xff] }
  0x30   : > { %v839_v61 = vsel %vm605_vm0, %v810_v58, 0  ;;  %5351 = vst [vmem:[#allocation9_spill] sm:$0xff] %v4431_v13  ;;  %5352 = vst [vmem:[#allocation10_spill] sm:$0xff] %v4434_v14  ;;  %v4441_v16 = vld [vmem:[%s4398_s25 + $0x40] sm:$0x3]  ;;  %v4445_v17 = vadd.f32 %v4434_v14, %v4392_v3  ;;  %v4448_v18 = vld [vmem:[%s4398_s25 + $0x10] sm:$0xff] }
  0x31   : > { %5349 = vst [vmem:[#allocation7_spill] sm:$0xff] %v4424_v11  ;;  %5354 = vst [vmem:[#allocation12_spill] sm:$0xff] %v4441_v16  ;;  %v4451_v19 = vld [vmem:[%s4398_s25 + $0x50] sm:$0x3]  ;;  %v4455_v20 = vadd.f32 %v4441_v16, %v4401_v4  ;;  %v4459_v21 = vadd.f32 %v4448_v18, %v4404_v5  ;;  %v4466_v23 = vld [vmem:[%s4377_s20 + $0x28] sm:$0xff] }
  0x32   : > { %3680 = vmatmul.mubr.msk.bf16.vlgmr.msra.gmra.mrb[4].mxu0 %vm601_vm1, %v3851_v15  ;;  %5355 = vst [vmem:[#allocation13_spill] sm:$0xff] %v4445_v17  ;;  %5356 = vst [vmem:[#allocation14_spill] sm:$0xff] %v4448_v18  ;;  %v4463_v22 = vadd.f32 %v4451_v19, %v4416_v9  ;;  %v4469_v24 = vld [vmem:[%s4377_s20 + $0x68] sm:$0x3]  ;;  %v4472_v25 = vld [vmem:[%s4377_s20 + $0x38] sm:$0xff] }
  0x33   : > { %845 = vmatpush1.bf16.msra.mxu0 %v821_v49  ;;  %876 = vmatprep.mubr.bf16.mxu0 %v5318_v0  ;;  %5357 = vst [vmem:[#allocation15_spill] sm:$0xff] %v4451_v19  ;;  %5358 = vst [vmem:[#allocation16_spill] sm:$0xff] %v4455_v20  ;;  %v4475_v26 = vld [vmem:[%s4377_s20 + $0x78] sm:$0x3]  ;;  %v4478_v27 = vld [vmem:[%s4377_s20 + $0x20] sm:$0xff] }
  0x34   : > { %3682 = vmatmul.mubr.msk.bf16.vlgmr.msra.gmra.mrb[4].mxu1 %vm601_vm1, %v3851_v15  ;;  %3688 = vmatprep.subr.msk.bf16.mxu0 %vm605_vm0, %v809_v51  ;;  %v4438_v15 = vadd.f32 %v4427_v12, %v4389_v2  ;;  %5359 = vst [vmem:[#allocation17_spill] sm:$0xff] %v4459_v21  ;;  %5360 = vst [vmem:[#allocation18_spill] sm:$0xff] %v4463_v22  ;;  %v4481_v28 = vld [vmem:[%s4377_s20 + $0x60] sm:$0x3]  ;;  %v4484_v29 = vld [vmem:[%s4377_s20 + $0x30] sm:$0xff] }
  0x35   : > { %886 = vmatpush1.bf16.msra.mxu1 %v827_v50  ;;  %917 = vmatprep.mubr.bf16.mxu1 %v5318_v0  ;;  %v4487_v32 = vld [vmem:[%s4398_s25 + $0x28] sm:$0xff]  ;;  %v4493_v36 = vld [vmem:[%s4398_s25 + $0x38] sm:$0xff]  ;;  %v4496_v39 = vld [vmem:[%s4377_s20 + $0x70] sm:$0x3] }
  0x36   : > { %3690 = vmatprep.subr.msk.bf16.mxu1 %vm605_vm0, %v811_v54  ;;  %5353 = vst [vmem:[#allocation11_spill] sm:$0xff] %v4438_v15  ;;  %5361 = vst [vmem:[#allocation19_spill] sm:$0xff] %v4487_v32  ;;  %v4490_v35 = vld [vmem:[%s4398_s25 + $0x68] sm:$0x3]  ;;  %v4500_v40 = vadd.f32 %v4487_v32, %v4466_v23  ;;  %v4507_v46 = vld [vmem:[%s4398_s25 + $0x78] sm:$0x3]  ;;  %v4511_v49 = vadd.f32 %v4493_v36, %v4472_v25 }
  0x37   : > { %5362 = vst [vmem:[#allocation20_spill] sm:$0xff] %v4490_v35  ;;  %5363 = vst [vmem:[#allocation21_spill] sm:$0xff] %v4493_v36  ;;  %v4504_v43 = vadd.f32 %v4490_v35, %v4469_v24  ;;  %v4514_v50 = vld [vmem:[%s4398_s25 + $0x20] sm:$0xff]  ;;  %v4518_v51 = vadd.f32 %v4507_v46, %v4475_v26  ;;  %v4528_v58 = vld [vmem:[%s4398_s25 + $0x30] sm:$0xff] }
  0x38   : > { %5364 = vst [vmem:[#allocation22_spill] sm:$0xff] %v4500_v40  ;;  %5366 = vst [vmem:[#allocation24_spill] sm:$0xff] %v4507_v46  ;;  %v4521_v54 = vld [vmem:[%s4398_s25 + $0x60] sm:$0x3]  ;;  %v4525_v57 = vadd.f32 %v4514_v50, %v4478_v27 }
  0x39   : > { %5365 = vst [vmem:[#allocation23_spill] sm:$0xff] %v4504_v43  ;;  %5367 = vst [vmem:[#allocation25_spill] sm:$0xff] %v4511_v49 }
  0x3a   : > { %3685 = vmatmul.mubr.msk.bf16.vlgmr.msra.gmra.mrb[8].mxu0 %vm601_vm1, %v3852_v59  ;;  %5368 = vst [vmem:[#allocation26_spill] sm:$0xff] %v4514_v50  ;;  %5369 = vst [vmem:[#allocation27_spill] sm:$0xff] %v4518_v51 }
  0x3b   : > { %927 = vmatpush1.bf16.msra.mxu0 %v833_v60  ;;  %958 = vmatprep.mubr.bf16.mxu0 %v5318_v0  ;;  %5370 = vst [vmem:[#allocation28_spill] sm:$0xff] %v4521_v54  ;;  %5371 = vst [vmem:[#allocation29_spill] sm:$0xff] %v4525_v57  ;;  %v4535_v60 = vadd.f32 %v4521_v54, %v4481_v28 }
  0x3c   : > { %3687 = vmatmul.mubr.msk.bf16.vlgmr.msra.gmra.mrb[8].mxu1 %vm601_vm1, %v3852_v59  ;;  %5372 = vst [vmem:[#allocation30_spill] sm:$0xff] %v4528_v58 }
  0x3d   : > { %968 = vmatpush1.bf16.msra.mxu1 %v839_v61  ;;  %999 = vmatprep.mubr.bf16.mxu1 %v5318_v0  ;;  %5374 = vst [vmem:[#allocation32_spill] sm:$0xff] %v4535_v60  ;;  %v4539_v61 = vadd.f32 %v4528_v58, %v4484_v29 }
  0x3f   : > { %5375 = vst [vmem:[#allocation33_spill] sm:$0xff] %v4539_v61 }
  0x42   : > { %3689 = vmatmul.mubr.msk.bf16.vlgmr.msra.gmra.mrb[12].mxu0 %vm601_vm1, %v3852_v59 }
  0x43   : > { %1225 = vmatprep.mubr.bf16.mxu0 %v5318_v0 }
  0x44   : > { %3691 = vmatmul.mubr.msk.bf16.vlgmr.msra.gmra.mrb[12].mxu1 %vm601_vm1, %v3852_v59  ;;  %v4531_v59 = vld [vmem:[%s4398_s25 + $0x70] sm:$0x3]  ;;  %s4731_s25 = scalar_lea.vmem %s5404_s1, %s4238_s28  ;;  %s4042_s1 = sshll.u32 %s4120_s0, 4  ;;  %s4043_s1 = int_to_ptr.vmem [resolvable:$false] %s4042_s1 }
  0x45   : > { %1268 = vmatprep.mubr.bf16.mxu1 %v5318_v0  ;;  %5373 = vst [vmem:[#allocation31_spill] sm:$0xff] %v4531_v59  ;;  %v4543_v0 = vadd.f32 %v4531_v59, %v4496_v39  ;;  %s4044_s2 = scalar_lea.vmem %s4043_s1, 256  ;;  %p4045_p1 = scmp.lt.s32.totalorder %s3433_s23, %s4043_s1 }
  0x47   : > { %5376 = vst [vmem:[#allocation34_spill] sm:$0xff] %v4543_v0 }
  0xfd   : > { %v4545_v51 = vpop.f32.mrb[0].mxu0 }
  0xfe   : > { %5377 = vst [vmem:[#allocation35_spill] sm:$0xff] %v4545_v51  ;;  %v4549_v43 = vpop.f32.mrb[1].mxu0 }
  0xff   : > { %v4547_v49 = vpop.f32.mrb[0].mxu1  ;;  %5379 = vst [vmem:[#allocation37_spill] sm:$0xff] %v4549_v43  ;;  %v4553_v57 = vpop.f32.mrb[2].mxu0 }
 0x100   : > { %5378 = vst [vmem:[#allocation36_spill] sm:$0xff] %v4547_v49  ;;  %v4551_v40 = vpop.f32.mrb[1].mxu1  ;;  %v4557_v60 = vpop.f32.mrb[3].mxu0 }
 0x101   : > { %5380 = vst [vmem:[#allocation38_spill] sm:$0xff] %v4551_v40  ;;  %v4555_v15 = vpop.f32.mrb[2].mxu1  ;;  %v1044_v40 = vpop.permute.xlu0 %1043 }
 0x102   : > { %5381 = vst [vmem:[#allocation39_spill] sm:$0xff] %v4555_v15  ;;  %v4559_v13 = vpop.f32.mrb[3].mxu1  ;;  %v1045_v49 = vrot.slane %v1044_v40, 6 }
 0x105   : > { %v4561_v61 = vpop.f32.mrb[4].mxu0 }
 0x106   : > { %5382 = vst [vmem:[#allocation40_spill] sm:$0xff] %v4561_v61  ;;  %v4565_v0 = vpop.f32.mrb[5].mxu0 }
 0x107   : > { %v4563_v11 = vpop.f32.mrb[4].mxu1  ;;  %5384 = vst [vmem:[#allocation42_spill] sm:$0xff] %v4565_v0  ;;  %v4569_v22 = vpop.f32.mrb[6].mxu0 }
 0x108   : > { %5383 = vst [vmem:[#allocation41_spill] sm:$0xff] %v4563_v11  ;;  %v4567_v10 = vpop.f32.mrb[5].mxu1  ;;  %v4573_v20 = vpop.f32.mrb[7].mxu0 }
 0x109   : > { %5385 = vst [vmem:[#allocation43_spill] sm:$0xff] %v4567_v10  ;;  %v4571_v21 = vpop.f32.mrb[6].mxu1  ;;  %5387 = vst [vmem:[#allocation45_spill] sm:$0xff] %v4573_v20 }
 0x10a   : > { %5386 = vst [vmem:[#allocation44_spill] sm:$0xff] %v4571_v21  ;;  %v4575_v17 = vpop.f32.mrb[7].mxu1 }
 0x10b   : > { %5388 = vst [vmem:[#allocation46_spill] sm:$0xff] %v4575_v17 }
 0x10d   : > { %v878_v43 = vpop.f32.mrb[8].mxu0 }
 0x10e   : > { %v1016_v51 = vrot.slane %v878_v43, 6  ;;  %v880_v61 = vpop.f32.mrb[9].mxu0 }
 0x10f   : > { %v919_v59 = vpop.f32.mrb[8].mxu1  ;;  %v1017_v11 = vrot.slane %v880_v61, 6  ;;  %v882_v0 = vpop.f32.mrb[10].mxu0 }
 0x110   : > { %v1018_v58 = vrot.slane %v919_v59, 6  ;;  %v921_v54 = vpop.f32.mrb[9].mxu1  ;;  %v1032_v10 = vadd.f32 %v1016_v51, %v4553_v57  ;;  %v883_v36 = vpop.f32.mrb[11].mxu0 }
 0x111   : > { %v1019_v50 = vrot.slane %v921_v54, 6  ;;  %v923_v46 = vpop.f32.mrb[10].mxu1  ;;  %v1033_v32 = vadd.f32 %v1017_v11, %v4557_v60 }
 0x112   : > { %v1034_v35 = vadd.f32 %v1018_v58, %v4555_v15  ;;  %v924_v19 = vpop.f32.mrb[11].mxu1  ;;  %v1047_v18 = vadd.f32 %v1045_v49, %v1032_v10 }
 0x113   : > { %v1035_v40 = vadd.f32 %v1019_v50, %v4559_v13  ;;  %v1048_v16 = vadd.f32 %v1045_v49, %v1033_v32 }
 0x114   : > { %v1049_v43 = vadd.f32 %v1045_v49, %v1034_v35  ;;  %v3692_v14 = vmul.f32 -1.442695, %v1047_v18 }
 0x115   : > { %v1050_v59 = vadd.f32 %v1045_v49, %v1035_v40  ;;  %v3693_v12 = vmul.f32 -1.442695, %v1048_v16  ;;  %v960_v0 = vpop.f32.mrb[12].mxu0 }
 0x116   : > { %v3694_v61 = vmul.f32 -1.442695, %v1049_v43  ;;  %3860 = vpow2.f32 %v3692_v14  ;;  %v1020_v54 = vrot.slane %v960_v0, 6  ;;  %v962_v36 = vpop.f32.mrb[13].mxu0 }
 0x117   : > { %v3695_v51 = vmul.f32 -1.442695, %v1050_v59  ;;  %v1001_v46 = vpop.f32.mrb[12].mxu1  ;;  %v1021_v15 = vrot.slane %v962_v36, 6  ;;  %v964_v19 = vpop.f32.mrb[14].mxu0 }
 0x118   : > { %3862 = vpow2.f32 %v3694_v61  ;;  %v1022_v58 = vrot.slane %v1001_v46, 6  ;;  %v1003_v11 = vpop.f32.mrb[13].mxu1  ;;  %v1036_v10 = vadd.f32 %v1020_v54, %v4569_v22  ;;  %v965_v18 = vpop.f32.mrb[15].mxu0 }
 0x119   : > { %3864 = vpow2.f32 %v3693_v12  ;;  %v1023_v35 = vrot.slane %v1003_v11, 6  ;;  %v1005_v32 = vpop.f32.mrb[14].mxu1  ;;  %v1037_v14 = vadd.f32 %v1021_v15, %v4573_v20 }
 0x11a   : > { %3866 = vpow2.f32 %v3695_v51  ;;  %v1038_v16 = vadd.f32 %v1022_v58, %v4571_v21  ;;  %v1006_v50 = vpop.f32.mrb[15].mxu1  ;;  %v1051_v40 = vadd.f32 %v1045_v49, %v1036_v10  ;;  %v1103_v32 = vlaneseq }
 0x11b   : > { %v1039_v43 = vadd.f32 %v1023_v35, %v4575_v17  ;;  %v1052_v61 = vadd.f32 %v1045_v49, %v1037_v14 }
 0x11c   : > { %v1053_v59 = vadd.f32 %v1045_v49, %v1038_v16  ;;  %v3696_v0 = vmul.f32 -1.442695, %v1051_v40 }
 0x11d   : > { %v1054_v46 = vadd.f32 %v1045_v49, %v1039_v43  ;;  %v3697_v12 = vmul.f32 -1.442695, %v1052_v61  ;;  %v4585_v49 = vshrl.u32 %v1103_v32, 7 }
 0x11e   : > { %v3698_v36 = vmul.f32 -1.442695, %v1053_v59  ;;  %3868 = vpow2.f32 %v3696_v0 }
 0x11f   : > { %v3699_v54 = vmul.f32 -1.442695, %v1054_v46  ;;  %v4588_v59 = vsub.s32 2, %v4585_v49 }
 0x120   : > { %3870 = vpow2.f32 %v3698_v36  ;;  %v3861_v11 = vpop.eup %3860 }
 0x121   : > { %3872 = vpow2.f32 %v3697_v12  ;;  %v1079_v19 = vadd.f32 1.0, %v3861_v11  ;;  %5389 = vst [vmem:[#allocation47_spill] sm:$0xff] %v4588_v59 }
 0x122   : > { %v3863_v51 = vpop.eup %3862  ;;  %3874 = vpow2.f32 %v3699_v54 }
 0x123   : > { %v3865_v58 = vpop.eup %3864  ;;  %v1081_v15 = vadd.f32 1.0, %v3863_v51  ;;  %3876 = vrcp.f32 %v1079_v19 }
 0x124   : > { %v3867_v10 = vpop.eup %3866  ;;  %v1080_v35 = vadd.f32 1.0, %v3865_v58 }
 0x125   : > { %3878 = vrcp.f32 %v1081_v15  ;;  %v1082_v18 = vadd.f32 1.0, %v3867_v10 }
 0x126   : > { %3880 = vrcp.f32 %v1080_v35 }
 0x127   : > { %3882 = vrcp.f32 %v1082_v18 }
 0x128   : > { %v3869_v16 = vpop.eup %3868 }
 0x129   : > { %v1083_v50 = vadd.f32 1.0, %v3869_v16 }
 0x12a   : > { %v3871_v14 = vpop.eup %3870 }
 0x12b   : > { %v3873_v40 = vpop.eup %3872  ;;  %v1085_v43 = vadd.f32 1.0, %v3871_v14  ;;  %3884 = vrcp.f32 %v1083_v50 }
 0x12c   : > { %v3875_v61 = vpop.eup %3874  ;;  %v1084_v0 = vadd.f32 1.0, %v3873_v40 }
 0x12d   : > { %3886 = vrcp.f32 %v1085_v43  ;;  %v1086_v46 = vadd.f32 1.0, %v3875_v61  ;;  %v4590_v36 = vpop.eup %3876 }
 0x12e   : > { %3888 = vrcp.f32 %v1084_v0  ;;  %v1106_v54 = vrot.slane %v4590_v36, %v4588_v59 }
 0x12f   : > { %v4592_v12 = vpop.eup %3878  ;;  %3890 = vrcp.f32 %v1086_v46 }
 0x130   : > { %v4596_v11 = vpop.eup %3880  ;;  %v1114_v51 = vrot.slane %v4592_v12, %v4588_v59  ;;  %v1135_v15 = vmul.f32 %v1106_v54, %v4296_v37  ;;  %v1143_v32 = vmul.f32 %v1106_v54, %v4299_v38 }
 0x131   : > { %v4600_v19 = vpop.eup %3882  ;;  %v1110_v58 = vrot.slane %v4596_v11, %v4588_v59 }
 0x132   : > { %v1118_v10 = vrot.slane %v4600_v19, %v4588_v59  ;;  %v1137_v35 = vmul.f32 %v1114_v51, %v4306_v41  ;;  %v1145_v18 = vmul.f32 %v1114_v51, %v4309_v42  ;;  %v1153_v50 = vpack.c.bf16 %v1143_v32, %v1135_v15  ;;  %v3853_v51 = vld [vmem:[%s5313_s5 + $0x10] sm:$0xff]  }
 0x133   : > { %v1136_v16 = vmul.f32 %v1110_v58, %v4279_v30  ;;  %v1144_v14 = vmul.f32 %v1110_v58, %v4282_v31 }
 0x134   : > { %v1138_v40 = vmul.f32 %v1118_v10, %v4286_v33  ;;  %v1146_v43 = vmul.f32 %v1118_v10, %v4289_v34  ;;  %v1155_v61 = vpack.c.bf16 %v1145_v18, %v1137_v35  ;;  %v1170_v46 = vsel %vm605_vm0, %v1153_v50, 0 }
 0x135   : > { %v1154_v0 = vpack.c.bf16 %v1144_v14, %v1136_v16  ;;  %v4615_v54 = vpop.eup %3884 }
 0x136   : > { %v1156_v17 = vpack.c.bf16 %v1146_v43, %v1138_v40  ;;  %v1176_v20 = vsel %vm605_vm0, %v1155_v61, 0  ;;  %v1122_v58 = vrot.slane %v4615_v54, %v4588_v59 }
 0x137   : > { %v4618_v21 = vpop.eup %3886  ;;  %3701 = vmatprep.subr.msk.bf16.mxu0 %vm605_vm0, %v1154_v0 }
 0x138   : > { %v4626_v15 = vpop.eup %3888  ;;  %3703 = vmatprep.subr.msk.bf16.mxu1 %vm605_vm0, %v1156_v17  ;;  %1194 = vmatpush1.bf16.msra.mxu0 %v1170_v46  ;;  %v1130_v32 = vrot.slane %v4618_v21, %v4588_v59  ;;  %v1139_v18 = vmul.f32 %v1122_v58, %v4337_v52  ;;  %v1147_v16 = vmul.f32 %v1122_v58, %v4340_v53  ;;  %v5390_v58 = vmov 0  }
 0x139   : > { %v4631_v10 = vpop.eup %3890  ;;  %1237 = vmatpush1.bf16.msra.mxu1 %v1176_v20  ;;  %v1126_v35 = vrot.slane %v4626_v15, %v4588_v59 }
 0x13a   : > { %v1134_v14 = vrot.slane %v4631_v10, %v4588_v59  ;;  %v1141_v50 = vmul.f32 %v1130_v32, %v4346_v55  ;;  %v1149_v17 = vmul.f32 %v1130_v32, %v4349_v56  ;;  %v1157_v43 = vpack.c.bf16 %v1147_v16, %v1139_v18 }
 0x13b   : > { %3702 = vmatmul.mubr.msk.bf16.vlgmr.msra.gmra.mrb[16].mxu0 %vm601_vm1, %v3853_v51  ;;  %v1140_v40 = vmul.f32 %v1126_v35, %v4316_v44  ;;  %v1148_v20 = vmul.f32 %v1126_v35, %v4319_v45  ;;  %v1568_v32 = vpack.c.bf16 %v4383_v63, %v4380_v62  ;;  %v1567_v45 = vpack.c.bf16 %v4401_v4, %v4392_v3  ;;  %v3854_v4 = vld [vmem:[%s5313_s5 + $0x18] sm:$0xff]  }
 0x13c   : > { %3704 = vmatmul.mubr.msk.bf16.vlgmr.msra.gmra.mrb[16].mxu1 %vm601_vm1, %v3853_v51  ;;  %v1142_v61 = vmul.f32 %v1134_v14, %v4327_v47  ;;  %v1150_v0 = vmul.f32 %v1134_v14, %v4330_v48  ;;  %v1159_v46 = vpack.c.bf16 %v1149_v17, %v1141_v50  ;;  %1311 = vmatprep.mubr.bf16.mxu0 %v5390_v58  ;;  %v1182_v53 = vsel %vm605_vm0, %v1157_v43, 0  ;;  %v5398_v50 = vld [vmem:[#allocation21_spill] sm:$0xff]  ;;  %v5399_v17 = vld [vmem:[#allocation24_spill] sm:$0xff] }
 0x13d   : > { %v1158_v59 = vpack.c.bf16 %v1148_v20, %v1140_v40  ;;  %1354 = vmatprep.mubr.bf16.mxu1 %v5390_v58  ;;  %v1570_v48 = vpack.c.bf16 %v4389_v2, %v4386_v1  ;;  %v1569_v16 = vpack.c.bf16 %v4416_v9, %v4404_v5  ;;  %v1584_v62 = vsel %vm605_vm0, %v1567_v45, 0  ;;  %v5400_v20 = vld [vmem:[#allocation26_spill] sm:$0xff]  ;;  %v5401_v43 = vld [vmem:[#allocation28_spill] sm:$0xff]  ;;  %v3855_v45 = vld [vmem:[%s5313_s5 + $0x20] sm:$0xff]  }
 0x13e   : > { %v1160_v35 = vpack.c.bf16 %v1150_v0, %v1142_v61  ;;  %v1188_v18 = vsel %vm605_vm0, %v1159_v46, 0  ;;  %v1572_v1 = vpack.c.bf16 %v4469_v24, %v4466_v23  ;;  %v1574_v2 = vpack.c.bf16 %v4475_v26, %v4472_v25  ;;  %v5391_v24 = vld [vmem:[#allocation8_spill] sm:$0xff]  ;;  %v5392_v26 = vld [vmem:[#allocation10_spill] sm:$0xff]  ;;  %v5403_v46 = vld [vmem:[#allocation31_spill] sm:$0xff] }
 0x13f   : > { %3705 = vmatprep.subr.msk.bf16.mxu0 %vm605_vm0, %v1158_v59  ;;  %v1590_v63 = vsel %vm605_vm0, %v1569_v16, 0  ;;  %v1573_v3 = vpack.c.bf16 %v4496_v39, %v4484_v29  ;;  %v1774_v23 = vpack.c.bf16 %v4410_v7, %v4407_v6  ;;  %v1776_v25 = vpack.c.bf16 %v5391_v24, %v4413_v8  ;;  %v5394_v29 = vld [vmem:[#allocation14_spill] sm:$0xff]  ;;  %v5395_v6 = vld [vmem:[#allocation15_spill] sm:$0xff]  ;;  %v2115_v16 = vld [vmem:[%s4731_s25 + $0x48] sm:$0x3] }
 0x140   : > { %3707 = vmatprep.subr.msk.bf16.mxu1 %vm605_vm0, %v1160_v35  ;;  %1280 = vmatpush1.bf16.msra.mxu0 %v1182_v53  ;;  %v1571_v53 = vpack.c.bf16 %v4481_v28, %v4478_v27  ;;  %v5393_v27 = vld [vmem:[#allocation12_spill] sm:$0xff]  ;;  %v1775_v7 = vpack.c.bf16 %v5395_v6, %v5394_v29  ;;  %v5396_v59 = vld [vmem:[#allocation19_spill] sm:$0xff]  ;;  %v1780_v40 = vpack.c.bf16 %v5399_v17, %v5398_v50  ;;  %v5402_v0 = vld [vmem:[#allocation30_spill] sm:$0xff] }
 0x141   : > { %1323 = vmatpush1.bf16.msra.mxu1 %v1188_v18  ;;  %3710 = vmatprep.subr.msk.bf16.mxu0 %vm605_vm0, %v1568_v32  ;;  %v1602_v9 = vsel %vm605_vm0, %v1573_v3, 0  ;;  %v1773_v28 = vpack.c.bf16 %v5393_v27, %v5392_v26  ;;  %v1777_v61 = vpack.c.bf16 %v5401_v43, %v5400_v20  ;;  %v1779_v32 = vpack.c.bf16 %v5403_v46, %v5402_v0  ;;  %v3856_v26 = vld [vmem:[%s5313_s5 + $0x28] sm:$0xff]   ;;  %v2113_v29 = vld [vmem:[%s4731_s25 + $0x38] sm:$0xff]  ;;  %v2120_v50 = vld [vmem:[%s4731_s25 + $0x70] sm:$0x3] }
 0x142   : > { %3712 = vmatprep.subr.msk.bf16.mxu1 %vm605_vm0, %v1570_v48  ;;  %v1596_v5 = vsel %vm605_vm0, %v1571_v53, 0  ;;  %v1796_v39 = vsel %vm605_vm0, %v1775_v7, 0  ;;  %v2107_v48 = vld [vmem:[%s4731_s25 + $0x8] sm:$0xff]  ;;  %v2114_v53 = vld [vmem:[%s4731_s25 + $0x40] sm:$0x3]  ;;  %v1397_v0 = vsub.f32 1.0, %v4590_v36 }
 0x143   : > { %3706 = vmatmul.mubr.msk.bf16.vlgmr.msra.gmra.mrb[20].mxu0 %vm601_vm1, %v3853_v51  ;;  %v1790_v8 = vsel %vm605_vm0, %v1773_v28, 0  ;;  %v1802_v35 = vsel %vm605_vm0, %v1777_v61, 0  ;;  %v1808_v18 = vsel %vm605_vm0, %v1779_v32, 0  ;;  %v2111_v27 = vld [vmem:[%s4731_s25 + $0x28] sm:$0xff]  ;;  %v2121_v7 = vld [vmem:[%s4731_s25 + $0x78] sm:$0x3] }
 0x144   : > { %3708 = vmatmul.mubr.msk.bf16.vlgmr.msra.gmra.mrb[20].mxu1 %vm601_vm1, %v3853_v51  ;;  %1608 = vmatpush1.bf16.msra.mxu0 %v1584_v62  ;;  %v5397_v51 = vld [vmem:[#allocation20_spill] sm:$0xff]  ;;  %v2109_v62 = vld [vmem:[%s4731_s25 + $0x18] sm:$0xff]  ;;  %v2630_v43 = vld [vmem:[%s5314_s6] sm:$0xff]  ;;  %v1399_v32 = vsub.f32 1.0, %v4592_v12 }
 0x145   : > { %1649 = vmatpush1.bf16.msra.mxu1 %v1590_v63  ;;  %1639 = vmatprep.mubr.bf16.mxu0 %v5390_v58  ;;  %v1778_v14 = vpack.c.bf16 %v5397_v51, %v5396_v59  ;;  %v2125_v63 = vpack.c.bf16 %v2115_v16, %v2107_v48  ;;  %v2119_v28 = vld [vmem:[%s4731_s25 + $0x68] sm:$0x3]  ;;  %v2131_v59 = vpack.c.bf16 %v2121_v7, %v2113_v29 }
 0x146   : > { %1680 = vmatprep.mubr.bf16.mxu1 %v5390_v58  ;;  %3714 = vmatprep.subr.msk.bf16.mxu0 %vm605_vm0, %v1572_v1  ;;  %v2117_v1 = vld [vmem:[%s4731_s25 + $0x58] sm:$0x3]  ;;  %v2129_v6 = vpack.c.bf16 %v2119_v28, %v2111_v27  ;;  %v2631_v61 = vld [vmem:[%s5314_s6 + $0x8] sm:$0x3]  ;;  %v5409_v27 = vld [vmem:[#allocation39_spill] sm:$0xff] }
 0x147   : > { %3716 = vmatprep.subr.msk.bf16.mxu1 %vm605_vm0, %v1574_v2  ;;  %v2106_v2 = vld [vmem:[%s4731_s25] sm:$0xff]  ;;  %v2127_v3 = vpack.c.bf16 %v2117_v1, %v2109_v62  ;;  %2634 = vperm.xlu1 %3850, %v2630_v43   ;;  %v5406_v62 = vld [vmem:[#allocation36_spill] sm:$0xff]  ;;  %v5407_v1 = vld [vmem:[#allocation37_spill] sm:$0xff] }
 0x148   : > { %v5412_v43 = vld [vmem:[#allocation42_spill] sm:$0xff] }
 0x14b   : > { %3711 = vmatmul.mubr.msk.bf16.vlgmr.msra.gmra.mrb[24].mxu0 %vm601_vm1, %v3854_v4  ;;  %2639 = vperm.xlu1 %3850, %v2631_v61  }
 0x14c   : > { %3713 = vmatmul.mubr.msk.bf16.vlgmr.msra.gmra.mrb[24].mxu1 %vm601_vm1, %v3854_v4  ;;  %1690 = vmatpush1.bf16.msra.mxu0 %v1596_v5  ;;  %v2108_v5 = vld [vmem:[%s4731_s25 + $0x10] sm:$0xff] }
 0x14d   : > { %1731 = vmatpush1.bf16.msra.mxu1 %v1602_v9  ;;  %1721 = vmatprep.mubr.bf16.mxu0 %v5390_v58  ;;  %v2116_v9 = vld [vmem:[%s4731_s25 + $0x50] sm:$0x3] }
 0x14e   : > { %1762 = vmatprep.mubr.bf16.mxu1 %v5390_v58  ;;  %3719 = vmatprep.subr.msk.bf16.mxu0 %vm605_vm0, %v1774_v23  ;;  %v2126_v23 = vpack.c.bf16 %v2116_v9, %v2108_v5  ;;  %v5408_v5 = vld [vmem:[#allocation38_spill] sm:$0xff] }
 0x14f   : > { %3721 = vmatprep.subr.msk.bf16.mxu1 %vm605_vm0, %v1776_v25 }
 0x150   : > { %v2147_v25 = vsel %vm605_vm0, %v2126_v23, 0 }
 0x153   : > { %3715 = vmatmul.mubr.msk.bf16.vlgmr.msra.gmra.mrb[28].mxu0 %vm601_vm1, %v3854_v4 }
 0x154   : > { %3717 = vmatmul.mubr.msk.bf16.vlgmr.msra.gmra.mrb[28].mxu1 %vm601_vm1, %v3854_v4  ;;  %1814 = vmatpush1.bf16.msra.mxu0 %v1790_v8  ;;  %v2124_v4 = vpack.c.bf16 %v2114_v53, %v2106_v2  ;;  %v2110_v8 = vld [vmem:[%s4731_s25 + $0x20] sm:$0xff] }
 0x155   : > { %1855 = vmatpush1.bf16.msra.mxu1 %v1796_v39  ;;  %1845 = vmatprep.mubr.bf16.mxu0 %v5390_v58  ;;  %v2118_v39 = vld [vmem:[%s4731_s25 + $0x60] sm:$0x3] }
 0x156   : > { %1886 = vmatprep.mubr.bf16.mxu1 %v5390_v58  ;;  %3723 = vmatprep.subr.msk.bf16.mxu0 %vm605_vm0, %v1778_v14  ;;  %v2141_v24 = vsel %vm605_vm0, %v2124_v4, 0  ;;  %v2128_v51 = vpack.c.bf16 %v2118_v39, %v2110_v8  ;;  %v2112_v14 = vld [vmem:[%s4731_s25 + $0x30] sm:$0xff]  ;;  %v1398_v8 = vsub.f32 1.0, %v4596_v11 }
 0x157   : > { %3725 = vmatprep.subr.msk.bf16.mxu1 %vm605_vm0, %v1780_v40  ;;  %v2130_v17 = vpack.c.bf16 %v2120_v50, %v2112_v14  ;;  %v5410_v50 = vld [vmem:[#allocation40_spill] sm:$0xff] }
 0x158   : > { %v2153_v40 = vsel %vm605_vm0, %v2128_v51, 0 }
 0x159   : > { %v2159_v20 = vsel %vm605_vm0, %v2130_v17, 0 }
 0x15b   : > { %3720 = vmatmul.mubr.msk.bf16.vlgmr.msra.gmra.mrb[32].mxu0 %vm601_vm1, %v3855_v45 }
 0x15c   : > { %3722 = vmatmul.mubr.msk.bf16.vlgmr.msra.gmra.mrb[32].mxu1 %vm601_vm1, %v3855_v45  ;;  %1896 = vmatpush1.bf16.msra.mxu0 %v1802_v35  ;;  %v5405_v35 = vld [vmem:[#allocation35_spill] sm:$0xff] }
 0x15d   : > { %1937 = vmatpush1.bf16.msra.mxu1 %v1808_v18  ;;  %1927 = vmatprep.mubr.bf16.mxu0 %v5390_v58 }
 0x15e   : > { %1968 = vmatprep.mubr.bf16.mxu1 %v5390_v58  ;;  %3736 = vmatprep.subr.msk.bf16.mxu0 %vm605_vm0, %v2125_v63 }
 0x15f   : > { %3738 = vmatprep.subr.msk.bf16.mxu1 %vm605_vm0, %v2127_v3 }
 0x163   : > { %3724 = vmatmul.mubr.msk.bf16.vlgmr.msra.gmra.mrb[36].mxu0 %vm601_vm1, %v3855_v45 }
 0x164   : > { %3726 = vmatmul.mubr.msk.bf16.vlgmr.msra.gmra.mrb[36].mxu1 %vm601_vm1, %v3855_v45  ;;  %2196 = vmatprep.mubr.bf16.mxu0 %v5390_v58  ;;  %v4777_v45 = vsub.s32 3, %v4585_v49 }
 0x165   : > { %2239 = vmatprep.mubr.bf16.mxu1 %v5390_v58  ;;  %2165 = vmatpush1.bf16.msra.mxu0 %v2141_v24 }
 0x166   : > { %2208 = vmatpush1.bf16.msra.mxu1 %v2147_v25  ;;  %3740 = vmatprep.subr.msk.bf16.mxu0 %vm605_vm0, %v2129_v6  ;;  %v1408_v4 = vrot.slane %v1397_v0, %v4777_v45  ;;  %v4792_v39 = vrot.slane %v4590_v36, %v4777_v45  ;;  %v4803_v14 = vrot.slane %v4596_v11, %v4777_v45 }
 0x167   : > { %3742 = vmatprep.subr.msk.bf16.mxu1 %vm605_vm0, %v2131_v59  ;;  %v4807_v36 = vrot.slane %v4600_v19, %v4777_v45 }
 0x168   : > { %v1437_v59 = vmul.f32 %v1408_v4, %v4296_v37 }
 0x16b   : > { %3737 = vmatmul.mubr.msk.bf16.vlgmr.msra.gmra.mrb[40].mxu0 %vm601_vm1, %v3856_v26 }
 0x16c   : > { %3739 = vmatmul.mubr.msk.bf16.vlgmr.msra.gmra.mrb[40].mxu1 %vm601_vm1, %v3856_v26  ;;  %2282 = vmatprep.mubr.bf16.mxu0 %v5390_v58 }
 0x16d   : > { %2325 = vmatprep.mubr.bf16.mxu1 %v5390_v58  ;;  %2251 = vmatpush1.bf16.msra.mxu0 %v2153_v40 }
 0x16e   : > { %2294 = vmatpush1.bf16.msra.mxu1 %v2159_v20 }
 0x173   : > { %3741 = vmatmul.mubr.msk.bf16.vlgmr.msra.gmra.mrb[44].mxu0 %vm601_vm1, %v3856_v26 }
 0x174   : > { %3743 = vmatmul.mubr.msk.bf16.vlgmr.msra.gmra.mrb[44].mxu1 %vm601_vm1, %v3856_v26  ;;  %2474 = vmatprep.mubr.bf16.mxu0 %v5390_v58  ;;  %v1416_v26 = vrot.slane %v1399_v32, %v4777_v45  ;;  %v5413_v32 = vld [vmem:[#allocation43_spill] sm:$0xff] }
 0x175   : > { %2517 = vmatprep.mubr.bf16.mxu1 %v5390_v58 }
 0x176   : > { %v1439_v51 = vmul.f32 %v1416_v26, %v4306_v41  ;;  %v1412_v41 = vrot.slane %v1398_v8, %v4777_v45 }
 0x20e   : > { %v1227_v46 = vpop.f32.mrb[16].mxu0 }
 0x20f   : > { %v1365_v18 = vadd.f32 %v1227_v46, %v5405_v35  ;;  %v1270_v48 = vpop.f32.mrb[16].mxu1  ;;  %v1229_v16 = vpop.f32.mrb[17].mxu0 }
 0x210   : > { %v1367_v63 = vadd.f32 %v1270_v48, %v5406_v62  ;;  %v1366_v2 = vadd.f32 %v1229_v16, %v5407_v1  ;;  %v1272_v53 = vpop.f32.mrb[17].mxu1  ;;  %v1231_v3 = vpop.f32.mrb[18].mxu0  ;;  %v1445_v16 = vmul.f32 %v1408_v4, %v4299_v38  ;;  %v5414_v62 = vld [vmem:[#allocation44_spill] sm:$0xff]  ;;  %v5415_v1 = vld [vmem:[#allocation45_spill] sm:$0xff]  ;;  %v1438_v38 = vmul.f32 %v1412_v41, %v4279_v30 }
 0x211   : > { %3892 = vtanh.f32 %v1365_v18  ;;  %v1368_v9 = vadd.f32 %v1272_v53, %v5408_v5  ;;  %v1373_v23 = vadd.f32 %v1231_v3, %v4553_v57  ;;  %v1274_v24 = vpop.f32.mrb[18].mxu1  ;;  %v1233_v25 = vpop.f32.mrb[19].mxu0  ;;  %v1400_v57 = vsub.f32 1.0, %v4600_v19 }
 0x212   : > { %3894 = vtanh.f32 %v1367_v63  ;;  %v1375_v28 = vadd.f32 %v1274_v24, %v5409_v27  ;;  %v1374_v29 = vadd.f32 %v1233_v25, %v4557_v60  ;;  %v1276_v6 = vpop.f32.mrb[19].mxu1  ;;  %v4799_v60 = vrot.slane %v4592_v12, %v4777_v45  ;;  %v5411_v12 = vld [vmem:[#allocation41_spill] sm:$0xff] }
 0x213   : > { %3896 = vtanh.f32 %v1366_v2  ;;  %v1376_v7 = vadd.f32 %v1276_v6, %v4559_v13  ;;  %v1420_v11 = vrot.slane %v1400_v57, %v4777_v45  ;;  %v1447_v5 = vmul.f32 %v1416_v26, %v4309_v42 }
 0x214   : > { %3898 = vtanh.f32 %v1368_v9  ;;  %v1401_v9 = vsub.f32 1.0, %v4615_v54  ;;  %v4826_v4 = vrot.slane %v4615_v54, %v4777_v45  ;;  %v1402_v6 = vsub.f32 1.0, %v4626_v15 }
 0x215   : > { %3900 = vtanh.f32 %v1373_v23  ;;  %v5416_v23 = vld [vmem:[#allocation46_spill] sm:$0xff]  ;;  %v1440_v26 = vmul.f32 %v1420_v11, %v4286_v33  ;;  %v1404_v33 = vsub.f32 1.0, %v4631_v10 }
 0x216   : > { %3902 = vtanh.f32 %v1375_v28  ;;  %v1313_v13 = vpop.f32.mrb[20].mxu0  ;;  %v1403_v28 = vsub.f32 1.0, %v4618_v21 }
 0x217   : > { %3904 = vtanh.f32 %v1374_v29  ;;  %v1369_v17 = vadd.f32 %v1313_v13, %v5410_v50  ;;  %v1356_v37 = vpop.f32.mrb[20].mxu1  ;;  %v1315_v40 = vpop.f32.mrb[21].mxu0 }
 0x218   : > { %3906 = vtanh.f32 %v1376_v7  ;;  %v1371_v20 = vadd.f32 %v1356_v37, %v5411_v12  ;;  %v1370_v61 = vadd.f32 %v1315_v40, %v5412_v43  ;;  %v1358_v0 = vpop.f32.mrb[21].mxu1  ;;  %v1317_v46 = vpop.f32.mrb[22].mxu0  ;;  %v1424_v12 = vrot.slane %v1401_v9, %v4777_v45 }
 0x219   : > { %3908 = vtanh.f32 %v1369_v17  ;;  %v1372_v19 = vadd.f32 %v1358_v0, %v5413_v32  ;;  %v1377_v35 = vadd.f32 %v1317_v46, %v4569_v22  ;;  %v1360_v18 = vpop.f32.mrb[22].mxu1  ;;  %v1319_v48 = vpop.f32.mrb[23].mxu0  ;;  %v1446_v46 = vmul.f32 %v1412_v41, %v4282_v31 }
 0x21a   : > { %3910 = vtanh.f32 %v1371_v20  ;;  %v1379_v63 = vadd.f32 %v1360_v18, %v5414_v62  ;;  %v1378_v2 = vadd.f32 %v1319_v48, %v5415_v1  ;;  %v1362_v53 = vpop.f32.mrb[23].mxu1  ;;  %v1432_v32 = vrot.slane %v1403_v28, %v4777_v45 }
 0x21b   : > { %v3893_v3 = vpop.eup %3892  ;;  %3912 = vtanh.f32 %v1370_v61  ;;  %v1380_v24 = vadd.f32 %v1362_v53, %v5416_v23  ;;  %v1448_v62 = vmul.f32 %v1420_v11, %v4289_v34  ;;  %v1480_v41 = vrot.slane %v4618_v21, %v4777_v45 }
 0x21c   : > { %v3895_v22 = vpop.eup %3894  ;;  %v1485_v25 = vmul.f32 %v3893_v3, %v4792_v39  ;;  %3914 = vtanh.f32 %v1372_v19  ;;  %v1436_v53 = vrot.slane %v1404_v33, %v4777_v45  ;;  %v1441_v34 = vmul.f32 %v1424_v12, %v4337_v52 }
 0x21d   : > { %v3897_v27 = vpop.eup %3896  ;;  %v1487_v42 = vmul.f32 %v3895_v22, %v4799_v60  ;;  %3916 = vtanh.f32 %v1377_v35  ;;  %v1476_v3 = vrot.slane %v4626_v15, %v4777_v45  ;;  %v1443_v9 = vmul.f32 %v1432_v32, %v4346_v55 }
 0x21e   : > { %v3899_v30 = vpop.eup %3898  ;;  %v1501_v29 = vadd.f32 %v1485_v25, %v1437_v59  ;;  %v1486_v54 = vmul.f32 %v3897_v27, %v4803_v14  ;;  %3918 = vtanh.f32 %v1379_v63  ;;  %v4839_v7 = vpop.f32.mrb[24].mxu0  ;;  %v1428_v63 = vrot.slane %v1402_v6, %v4777_v45 }
 0x21f   : > { %v3901_v8 = vpop.eup %3900  ;;  %v1503_v57 = vadd.f32 %v1487_v42, %v1439_v51  ;;  %v1488_v13 = vmul.f32 %v3899_v30, %v4807_v36  ;;  %3920 = vtanh.f32 %v1378_v2  ;;  %v4843_v50 = vpop.f32.mrb[24].mxu1  ;;  %v1484_v21 = vrot.slane %v4631_v10, %v4777_v45 }
 0x220   : > { %v4845_v17 = vpop.f32.mrb[25].mxu0  ;;  %v3903_v59 = vpop.eup %3902  ;;  %1517 = vst [vmem:[%s4832_s26] sm:$0xff] %v1501_v29  ;;  %v1502_v37 = vadd.f32 %v1486_v54, %v1438_v38  ;;  %v1493_v40 = vmul.f32 %v3901_v8, %v4792_v39  ;;  %3922 = vtanh.f32 %v1380_v24  ;;  %v1442_v52 = vmul.f32 %v1428_v63, %v4316_v44  ;;  %v5417_v44 = vld [vmem:[#allocation5_spill] sm:$0xff] }
 0x221   : > { %v4850_v20 = vpop.f32.mrb[25].mxu1  ;;  %v1645_v51 = vpop.f32.mrb[26].mxu0  ;;  %1519 = vst [vmem:[%s4832_s26 + $0x10] sm:$0xff] %v1503_v57  ;;  %v1504_v61 = vadd.f32 %v1488_v13, %v1440_v26  ;;  %v1495_v0 = vmul.f32 %v3903_v59, %v4799_v60  ;;  %v1444_v42 = vmul.f32 %v1436_v53, %v4327_v47  ;;  %v1449_v29 = vmul.f32 %v1424_v12, %v5417_v44 }
 0x222   : > { %v3905_v43 = vpop.eup %3904  ;;  %v1686_v19 = vpop.f32.mrb[26].mxu1  ;;  %1518 = vst [vmem:[%s4832_s26 + $0x8] sm:$0xff] %v1502_v37  ;;  %v1509_v18 = vadd.f32 %v1493_v40, %v1445_v16  ;;  %v1451_v13 = vmul.f32 %v1432_v32, %v4349_v56  ;;  %v4020_v51 = vld [vmem:[%s4265_s27 + $0x68] sm:$0x3] }
 0x223   : > { %v1646_v35 = vpop.f32.mrb[27].mxu0  ;;  %v3907_v39 = vpop.eup %3906  ;;  %v1494_v48 = vmul.f32 %v3905_v43, %v4803_v14  ;;  %1520 = vst [vmem:[%s4832_s26 + $0x18] sm:$0xff] %v1504_v61  ;;  %v1511_v60 = vadd.f32 %v1495_v0, %v1447_v5 }
 0x224   : > { %v1687_v1 = vpop.f32.mrb[27].mxu1  ;;  %v3909_v2 = vpop.eup %3908  ;;  %v1496_v31 = vmul.f32 %v3907_v39, %v4807_v36  ;;  %1525 = vst [vmem:[%s4832_s26 + $0x40] sm:$0x3] %v1509_v18 }
 0x225   : > { %v3911_v16 = vpop.eup %3910  ;;  %v1510_v14 = vadd.f32 %v1494_v48, %v1446_v46  ;;  %v1489_v11 = vmul.f32 %v3909_v2, %v4826_v4  ;;  %1527 = vst [vmem:[%s4832_s26 + $0x50] sm:$0x3] %v1511_v60  ;;  %v4021_v46 = vld [vmem:[%s4265_s27 + $0x78] sm:$0x3]  ;;  %v1989_v39 = vpop.permute.xlu0 %1988 }
 0x226   : > { %v3913_v5 = vpop.eup %3912  ;;  %v1512_v36 = vadd.f32 %v1496_v31, %v1448_v62  ;;  %v1491_v23 = vmul.f32 %v3911_v16, %v1480_v41  ;;  %v4876_v38 = vpop.f32.mrb[28].mxu0  ;;  %v1452_v19 = vmul.f32 %v4021_v46, %v1436_v53  ;;  %v2354_v46 = vsub.s32 0, %v4585_v49 }
 0x227   : > { %v3915_v24 = vpop.eup %3914  ;;  %1526 = vst [vmem:[%s4832_s26 + $0x48] sm:$0x3] %v1510_v14  ;;  %v1505_v22 = vadd.f32 %v1489_v11, %v1441_v34  ;;  %v1490_v25 = vmul.f32 %v3913_v5, %v1476_v3  ;;  %v4880_v26 = vpop.f32.mrb[28].mxu1 }
 0x228   : > { %v3917_v15 = vpop.eup %3916  ;;  %1528 = vst [vmem:[%s4832_s26 + $0x58] sm:$0x3] %v1512_v36  ;;  %v1507_v27 = vadd.f32 %v1491_v23, %v1443_v9  ;;  %v1492_v55 = vmul.f32 %v3915_v24, %v1484_v21  ;;  %v4882_v28 = vpop.f32.mrb[29].mxu0 }
 0x229   : > { %v3919_v10 = vpop.eup %3918  ;;  %1521 = vst [vmem:[%s4832_s26 + $0x20] sm:$0xff] %v1505_v22  ;;  %v1506_v30 = vadd.f32 %v1490_v25, %v1442_v52  ;;  %v1497_v54 = vmul.f32 %v3917_v15, %v4826_v4  ;;  %v1766_v6 = vpop.f32.mrb[29].mxu1  ;;  %v1450_v4 = vmul.f32 %v4020_v51, %v1428_v63 }
 0x22a   : > { %v1727_v8 = vpop.f32.mrb[30].mxu0  ;;  %v3921_v57 = vpop.eup %3920  ;;  %1523 = vst [vmem:[%s4832_s26 + $0x30] sm:$0xff] %v1507_v27  ;;  %v1508_v47 = vadd.f32 %v1492_v55, %v1444_v42  ;;  %v1499_v33 = vmul.f32 %v3919_v10, %v1480_v41 }
 0x22b   : > { %v1768_v59 = vpop.f32.mrb[30].mxu1  ;;  %v1728_v37 = vpop.f32.mrb[31].mxu0  ;;  %1522 = vst [vmem:[%s4832_s26 + $0x28] sm:$0xff] %v1506_v30  ;;  %v1513_v12 = vadd.f32 %v1497_v54, %v1449_v29  ;;  %v1498_v43 = vmul.f32 %v3921_v57, %v1476_v3 }
 0x22c   : > { %v3923_v40 = vpop.eup %3922  ;;  %v1769_v61 = vpop.f32.mrb[31].mxu1  ;;  %1524 = vst [vmem:[%s4832_s26 + $0x38] sm:$0xff] %v1508_v47  ;;  %v1515_v0 = vadd.f32 %v1499_v33, %v1451_v13 }
 0x22d   : > { %v1500_v35 = vmul.f32 %v3923_v40, %v1484_v21  ;;  %1529 = vst [vmem:[%s4832_s26 + $0x60] sm:$0x3] %v1513_v12  ;;  %v1514_v56 = vadd.f32 %v1498_v43, %v1450_v4  ;;  %v4119_v40 = vmov 1966171168  }
 0x22e   : > { %1531 = vst [vmem:[%s4832_s26 + $0x70] sm:$0x3] %v1515_v0  ;;  %v1847_v18 = vpop.f32.mrb[32].mxu0  ;;  %v2060_v12 = vunpack.c.l.s4 %v4119_v40  ;;  %v5428_v40 = vld [vmem:[#allocation33_spill] sm:$0xff] }
 0x22f   : > { %v1516_v32 = vadd.f32 %v1500_v35, %v1452_v19  ;;  %1530 = vst [vmem:[%s4832_s26 + $0x68] sm:$0x3] %v1514_v56  ;;  %v1977_v48 = vadd.f32 %v1847_v18, %v4839_v7  ;;  %v1888_v62 = vpop.f32.mrb[32].mxu1  ;;  %v1849_v1 = vpop.f32.mrb[33].mxu0 }
 0x230   : > { %v1979_v63 = vadd.f32 %v1888_v62, %v4843_v50  ;;  %v1978_v2 = vadd.f32 %v1849_v1, %v4845_v17  ;;  %v1890_v60 = vpop.f32.mrb[33].mxu1  ;;  %v1851_v31 = vpop.f32.mrb[34].mxu0  ;;  %v2061_v19 = vunpack.c.0.s8 %v2060_v12 }
 0x231   : > { %1532 = vst [vmem:[%s4832_s26 + $0x78] sm:$0x3] %v1516_v32  ;;  %v1991_v41 = vadd.f32 %v1989_v39, %v1977_v48  ;;  %v1980_v53 = vadd.f32 %v1890_v60, %v4850_v20  ;;  %v1892_v16 = vpop.f32.mrb[34].mxu1  ;;  %v1852_v14 = vpop.f32.mrb[35].mxu0  ;;  %v5418_v31 = vld [vmem:[#allocation13_spill] sm:$0xff]  ;;  %s4038_s26 = scalar_lea.vmem %s3433_s23, 128 }
 0x232   : > { %v1993_v34 = vadd.f32 %v1989_v39, %v1979_v63  ;;  %v1992_v11 = vadd.f32 %v1989_v39, %v1978_v2  ;;  %v1893_v3 = vpop.f32.mrb[35].mxu1  ;;  %v4906_v62 = vsub.s32 %v2061_v19, %v4585_v49  ;;  %v5431_v19 = vld [vmem:[#allocation23_spill] sm:$0xff]  ;;  %p4039_p12 = scmp.ne.s32.totalorder %s3433_s23, %s4038_s26  ;;  %p4046_p2 = scmp.lt.s32.totalorder %s4044_s2, %s4038_s26 }
 0x233   : > { %v3727_v5 = vmul.f32 -1.442695, %v1991_v41  ;;  %v1994_v36 = vadd.f32 %v1989_v39, %v1980_v53  ;;  %v5419_v53 = vld [vmem:[#allocation16_spill] sm:$0xff] }
 0x234   : > { %v3729_v9 = vmul.f32 -1.442695, %v1993_v34  ;;  %v3728_v7 = vmul.f32 -1.442695, %v1992_v11  ;;  %v5420_v11 = vld [vmem:[#allocation17_spill] sm:$0xff]  ;;  %p4040_p13 = pnand %p4039_p12, %p4211_p4  ;;  %p4047_p3 = por %p4046_p2, %p4045_p1 }
 0x235   : > { %3924 = vpow2.f32 %v3727_v5  ;;  %v3730_v23 = vmul.f32 -1.442695, %v1994_v36  ;;  %v5421_v5 = vld [vmem:[#allocation18_spill] sm:$0xff] }
 0x236   : > { %3926 = vpow2.f32 %v3729_v9  ;;  %v1929_v50 = vpop.f32.mrb[36].mxu0  ;;  %p4041_p0 = pneg %p4040_p13 }
 0x237   : > { %3928 = vpow2.f32 %v3728_v7  ;;  %v1981_v17 = vadd.f32 %v1929_v50, %v4876_v38  ;;  %v1970_v21 = vpop.f32.mrb[36].mxu1  ;;  %v1931_v24 = vpop.f32.mrb[37].mxu0  ;;  %v5422_v7 = vld [vmem:[#allocation6_spill] sm:$0xff]  ;;  %v5423_v50 = vld [vmem:[#allocation7_spill] sm:$0xff] }
 0x238   : > { %3930 = vpow2.f32 %v3730_v23  ;;  %v1983_v20 = vadd.f32 %v1970_v21, %v4880_v26  ;;  %v1982_v22 = vadd.f32 %v1931_v24, %v4882_v28  ;;  %v1972_v52 = vpop.f32.mrb[37].mxu1  ;;  %v1933_v25 = vpop.f32.mrb[38].mxu0  ;;  %v5424_v24 = vld [vmem:[#allocation9_spill] sm:$0xff]  ;;  %p4048_p5 = pnand %p4047_p3, %p4041_p0 }
 0x239   : > { %v1995_v15 = vadd.f32 %v1989_v39, %v1981_v17  ;;  %v1984_v27 = vadd.f32 %v1972_v52, %v1766_v6  ;;  %v1974_v42 = vpop.f32.mrb[38].mxu1  ;;  %v1934_v55 = vpop.f32.mrb[39].mxu0 }
 0x23a   : > { %v1997_v10 = vadd.f32 %v1989_v39, %v1983_v20  ;;  %v1996_v30 = vadd.f32 %v1989_v39, %v1982_v22  ;;  %v1975_v44 = vpop.f32.mrb[39].mxu1  ;;  %v5425_v22 = vld [vmem:[#allocation11_spill] sm:$0xff] }
 0x23b   : > { %v3731_v29 = vmul.f32 -1.442695, %v1995_v15  ;;  %v1998_v54 = vadd.f32 %v1989_v39, %v1984_v27 }
 0x23c   : > { %v3733_v8 = vmul.f32 -1.442695, %v1997_v10  ;;  %v3732_v38 = vmul.f32 -1.442695, %v1996_v30 }
 0x23d   : > { %3932 = vpow2.f32 %v3731_v29  ;;  %v3734_v57 = vmul.f32 -1.442695, %v1998_v54  ;;  %v3857_v54 = vld [vmem:[%s5313_s5 + $0x30] sm:$0xff]  }
 0x23e   : > { %3934 = vpow2.f32 %v3733_v8 }
 0x23f   : > { %v3925_v47 = vpop.eup %3924  ;;  %3936 = vpow2.f32 %v3732_v38 }
 0x240   : > { %v3927_v26 = vpop.eup %3926  ;;  %v2023_v28 = vadd.f32 1.0, %v3925_v47  ;;  %3938 = vpow2.f32 %v3734_v57 }
 0x241   : > { %v3929_v13 = vpop.eup %3928  ;;  %v2025_v33 = vadd.f32 1.0, %v3927_v26 }
 0x242   : > { %v3931_v6 = vpop.eup %3930  ;;  %3940 = vrcp.f32 %v2023_v28  ;;  %v2024_v59 = vadd.f32 1.0, %v3929_v13  ;;  %v5426_v28 = vld [vmem:[#allocation29_spill] sm:$0xff] }
 0x243   : > { %3942 = vrcp.f32 %v2025_v33  ;;  %v2026_v37 = vadd.f32 1.0, %v3931_v6  ;;  %v5427_v33 = vld [vmem:[#allocation32_spill] sm:$0xff] }
 0x244   : > { %3944 = vrcp.f32 %v2024_v59 }
 0x245   : > { %3946 = vrcp.f32 %v2026_v37 }
 0x247   : > { %v3933_v51 = vpop.eup %3932 }
 0x248   : > { %v3935_v4 = vpop.eup %3934  ;;  %v2027_v43 = vadd.f32 1.0, %v3933_v51  ;;  %v5429_v51 = vld [vmem:[#allocation34_spill] sm:$0xff] }
 0x249   : > { %v3937_v61 = vpop.eup %3936  ;;  %v2029_v0 = vadd.f32 1.0, %v3935_v4 }
 0x24a   : > { %v3939_v35 = vpop.eup %3938  ;;  %3948 = vrcp.f32 %v2027_v43  ;;  %v2028_v56 = vadd.f32 1.0, %v3937_v61  ;;  %v5430_v61 = vld [vmem:[#allocation22_spill] sm:$0xff] }
 0x24b   : > { %3950 = vrcp.f32 %v2029_v0  ;;  %v2030_v32 = vadd.f32 1.0, %v3939_v35 }
 0x24c   : > { %v3941_v39 = vpop.eup %3940  ;;  %3952 = vrcp.f32 %v2028_v56 }
 0x24d   : > { %v3943_v18 = vpop.eup %3942  ;;  %3954 = vrcp.f32 %v2030_v32  ;;  %v2355_v48 = vrot.slane %v3941_v39, %v2354_v46 }
 0x24e   : > { %v3945_v1 = vpop.eup %3944  ;;  %v2363_v63 = vrot.slane %v3943_v18, %v2354_v46 }
 0x24f   : > { %v3947_v2 = vpop.eup %3946  ;;  %v2359_v60 = vrot.slane %v3945_v1, %v2354_v46  ;;  %v2384_v41 = vmul.f32 %v2355_v48, %v5418_v31  ;;  %v2392_v16 = vmul.f32 %v2355_v48, %v5419_v53  ;;  %v2055_v14 = vcombine.low %v3941_v39, %v3945_v1  ;;  %v5432_v39 = vld [vmem:[#allocation25_spill] sm:$0xff] }
 0x250   : > { %v2367_v34 = vrot.slane %v3947_v2, %v2354_v46  ;;  %v2386_v3 = vmul.f32 %v2363_v63, %v5420_v11  ;;  %v2394_v36 = vmul.f32 %v2363_v63, %v5421_v5  ;;  %v2056_v9 = vcombine.low %v3943_v18, %v3947_v2  ;;  %v2198_v11 = vpop.f32.mrb[40].mxu0 }
 0x251   : > { %v2385_v23 = vmul.f32 %v2359_v60, %v5422_v7  ;;  %v2393_v49 = vmul.f32 %v2359_v60, %v5423_v50  ;;  %v2402_v17 = vpack.c.bf16 %v2392_v16, %v2384_v41  ;;  %v2065_v21 = vrot.slane %v2055_v14, %v4906_v62  ;;  %v2200_v5 = vpop.f32.mrb[41].mxu0 }
 0x252   : > { %v2387_v20 = vmul.f32 %v2367_v34, %v5424_v24  ;;  %v2395_v52 = vmul.f32 %v2367_v34, %v5425_v22  ;;  %v2404_v25 = vpack.c.bf16 %v2394_v36, %v2386_v3  ;;  %v2072_v15 = vrot.slane %v2056_v9, %v4906_v62  ;;  %v2241_v3 = vpop.f32.mrb[40].mxu1  ;;  %v4957_v9 = vpop.f32.mrb[42].mxu0 }
 0x253   : > { %v2403_v27 = vpack.c.bf16 %v2393_v49, %v2385_v23  ;;  %v2419_v42 = vsel %vm605_vm0, %v2402_v17, 0  ;;  %v2243_v36 = vpop.f32.mrb[41].mxu1 }
 0x254   : > { %v3949_v55 = vpop.eup %3948  ;;  %v2405_v10 = vpack.c.bf16 %v2395_v52, %v2387_v20  ;;  %v2425_v30 = vsel %vm605_vm0, %v2404_v25, 0  ;;  %v2087_v44 = vcombine.low %v2065_v21, %v2072_v15  ;;  %v4959_v7 = vpop.f32.mrb[42].mxu1 }
 0x255   : > { %v3951_v29 = vpop.eup %3950  ;;  %3745 = vmatprep.subr.msk.bf16.mxu0 %vm605_vm0, %v2403_v27  ;;  %v2371_v8 = vrot.slane %v3949_v55, %v2354_v46  ;;  %v4963_v23 = vpop.f32.mrb[43].mxu1 }
 0x256   : > { %v3953_v38 = vpop.eup %3952  ;;  %3747 = vmatprep.subr.msk.bf16.mxu1 %vm605_vm0, %v2405_v10  ;;  %2443 = vmatpush1.bf16.msra.mxu0 %v2419_v42  ;;  %v2379_v57 = vrot.slane %v3951_v29, %v2354_v46  ;;  %v2095_v16 = vrot.slane %v2087_v44, %v4906_v62  ;;  %v2327_v49 = vpop.f32.mrb[44].mxu1 }
 0x257   : > { %v3955_v47 = vpop.eup %3954  ;;  %2486 = vmatpush1.bf16.msra.mxu1 %v2425_v30  ;;  %v2375_v26 = vrot.slane %v3953_v38, %v2354_v46  ;;  %v2388_v13 = vmul.f32 %v2371_v8, %v5426_v28  ;;  %v2396_v6 = vmul.f32 %v2371_v8, %v5427_v33  ;;  %v2057_v59 = vcombine.low %v3949_v55, %v3953_v38  ;;  %v2329_v21 = vpop.f32.mrb[45].mxu1 }
 0x258   : > { %v2383_v37 = vrot.slane %v3955_v47, %v2354_v46  ;;  %v2390_v12 = vmul.f32 %v2379_v57, %v5428_v40  ;;  %v2398_v4 = vmul.f32 %v2379_v57, %v5429_v51  ;;  %v2058_v43 = vcombine.low %v3951_v29, %v3955_v47  ;;  %v5433_v46 = vld [vmem:[#allocation27_spill] sm:$0xff]  ;;  %v4967_v20 = vpop.f32.mrb[46].mxu1  ;;  %v2635_v25 = vpop.permute.xlu1 %2634 }
 0x259   : > { %3746 = vmatmul.mubr.msk.bf16.vlgmr.msra.gmra.mrb[48].mxu0 %vm601_vm1, %v3857_v54  ;;  %v2389_v0 = vmul.f32 %v2375_v26, %v5430_v61  ;;  %v2397_v35 = vmul.f32 %v2375_v26, %v5431_v19  ;;  %v2406_v56 = vpack.c.bf16 %v2396_v6, %v2388_v13  ;;  %v2079_v32 = vrot.slane %v2057_v59, %v4906_v62  ;;  %v4971_v52 = vpop.f32.mrb[47].mxu1 }
 0x25a   : > { %3748 = vmatmul.mubr.msk.bf16.vlgmr.msra.gmra.mrb[48].mxu1 %vm601_vm1, %v3857_v54  ;;  %v2391_v18 = vmul.f32 %v2383_v37, %v5432_v39  ;;  %v2399_v48 = vmul.f32 %v2383_v37, %v5433_v46  ;;  %v2408_v1 = vpack.c.bf16 %v2398_v4, %v2390_v12  ;;  %2560 = vmatprep.mubr.bf16.mxu0 %v5390_v58 }
 0x25b   : > { %v2407_v63 = vpack.c.bf16 %v2397_v35, %v2389_v0  ;;  %v2431_v2 = vsel %vm605_vm0, %v2406_v56, 0  ;;  %2603 = vmatprep.mubr.bf16.mxu1 %v5390_v58  ;;  %v2086_v60 = vrot.slane %v2058_v43, %v4906_v62 }
 0x25c   : > { %v2409_v31 = vpack.c.bf16 %v2399_v48, %v2391_v18  ;;  %v2437_v41 = vsel %vm605_vm0, %v2408_v1, 0  ;;  %v2640_v28 = vpop.permute.xlu1 %2639 }
 0x25d   : > { %3749 = vmatprep.subr.msk.bf16.mxu0 %vm605_vm0, %v2407_v63  ;;  %v2088_v53 = vcombine.low %v2079_v32, %v2086_v60 }
 0x25e   : > { %3751 = vmatprep.subr.msk.bf16.mxu1 %vm605_vm0, %v2409_v31  ;;  %2529 = vmatpush1.bf16.msra.mxu0 %v2431_v2 }
 0x25f   : > { %2572 = vmatpush1.bf16.msra.mxu1 %v2437_v41  ;;  %v2102_v14 = vrot.slane %v2088_v53, %v4906_v62  ;;  %v4961_v62 = vpop.f32.mrb[43].mxu0 }
 0x260   : > { %v2284_v50 = vpop.f32.mrb[44].mxu0 }
 0x261   : > { %3750 = vmatmul.mubr.msk.bf16.vlgmr.msra.gmra.mrb[52].mxu0 %vm601_vm1, %v3857_v54  ;;  %v2103_v34 = vcombine.low %v2095_v16, %v2102_v14  ;;  %v2286_v17 = vpop.f32.mrb[45].mxu0 }
 0x262   : > { %3752 = vmatmul.mubr.msk.bf16.vlgmr.msra.gmra.mrb[52].mxu1 %vm601_vm1, %v3857_v54  ;;  %2748 = vmatprep.mubr.bf16.mxu0 %v5390_v58  ;;  %v4965_v24 = vpop.f32.mrb[46].mxu0 }
 0x263   : > { %2791 = vmatprep.mubr.bf16.mxu1 %v5390_v58  ;;  %2105 = vst [vmem:[%s481_s18] sm:$0xff] %v2103_v34  ;;  %v4969_v22 = vpop.f32.mrb[47].mxu0 }
 0x32c   : > { %v2476_v15 = vpop.f32.mrb[48].mxu0 }
 0x32d   : > { %v2614_v27 = vadd.f32 %v2476_v15, %v2198_v11  ;;  %v2519_v42 = vpop.f32.mrb[48].mxu1  ;;  %v2478_v55 = vpop.f32.mrb[49].mxu0 }
 0x32e   : > { %v2616_v10 = vadd.f32 %v2519_v42, %v2241_v3  ;;  %v2615_v30 = vadd.f32 %v2478_v55, %v2200_v5  ;;  %v2521_v44 = vpop.f32.mrb[49].mxu1  ;;  %v2480_v29 = vpop.f32.mrb[50].mxu0 }
 0x32f   : > { %v2642_v54 = vadd.f32 %v2635_v25, %v2614_v27  ;;  %v2617_v8 = vadd.f32 %v2521_v44, %v2243_v36  ;;  %v2622_v38 = vadd.f32 %v2480_v29, %v4957_v9  ;;  %v2523_v57 = vpop.f32.mrb[50].mxu1  ;;  %v2482_v47 = vpop.f32.mrb[51].mxu0 }
 0x330   : > { %v2644_v26 = vadd.f32 %v2635_v25, %v2616_v10  ;;  %v2643_v13 = vadd.f32 %v2635_v25, %v2615_v30  ;;  %v2624_v33 = vadd.f32 %v2523_v57, %v4959_v7  ;;  %v2623_v6 = vadd.f32 %v2482_v47, %v4961_v62  ;;  %v2525_v59 = vpop.f32.mrb[51].mxu1  ;;  %v3858_v47 = vld [vmem:[%s5313_s5 + $0x38] sm:$0xff]  }
 0x331   : > { %v2645_v37 = vadd.f32 %v2635_v25, %v2617_v8  ;;  %v2650_v40 = vadd.f32 %v2640_v28, %v2622_v38  ;;  %v2625_v12 = vadd.f32 %v2525_v59, %v4963_v23  ;;  %v2658_v43 = vmax.f32 %v2642_v54, 0.0 }
 0x332   : > { %v2652_v51 = vadd.f32 %v2640_v28, %v2624_v33  ;;  %v2651_v4 = vadd.f32 %v2640_v28, %v2623_v6  ;;  %v2660_v19 = vmax.f32 %v2644_v26, 0.0  ;;  %v2659_v35 = vmax.f32 %v2643_v13, 0.0 }
 0x333   : > { %v2666_v61 = vmax.f32 %v2650_v40, 0.0  ;;  %v2653_v0 = vadd.f32 %v2640_v28, %v2625_v12  ;;  %v2661_v18 = vmax.f32 %v2645_v37, 0.0 }
 0x334   : > { %v2668_v56 = vmax.f32 %v2652_v51, 0.0  ;;  %v2667_v32 = vmax.f32 %v2651_v4, 0.0  ;;  %v2562_v39 = vpop.f32.mrb[52].mxu0 }
 0x335   : > { %v2676_v46 = vpack.c.bf16 %v2666_v61, %v2658_v43  ;;  %v2669_v48 = vmax.f32 %v2653_v0, 0.0  ;;  %v2618_v1 = vadd.f32 %v2562_v39, %v2284_v50  ;;  %v2605_v63 = vpop.f32.mrb[52].mxu1  ;;  %v2564_v2 = vpop.f32.mrb[53].mxu0 }
 0x336   : > { %v2678_v60 = vpack.c.bf16 %v2668_v56, %v2660_v19  ;;  %v2677_v31 = vpack.c.bf16 %v2667_v32, %v2659_v35  ;;  %v2620_v41 = vadd.f32 %v2605_v63, %v2327_v49  ;;  %v2619_v53 = vadd.f32 %v2564_v2, %v2286_v17  ;;  %v2607_v16 = vpop.f32.mrb[53].mxu1  ;;  %v2566_v14 = vpop.f32.mrb[54].mxu0 }
 0x337   : > { %v2679_v34 = vpack.c.bf16 %v2669_v48, %v2661_v18  ;;  %v2646_v11 = vadd.f32 %v2635_v25, %v2618_v1  ;;  %v2621_v3 = vadd.f32 %v2607_v16, %v2329_v21  ;;  %v2626_v5 = vadd.f32 %v2566_v14, %v4965_v24  ;;  %v2609_v36 = vpop.f32.mrb[54].mxu1  ;;  %v2568_v15 = vpop.f32.mrb[55].mxu0 }
 0x338   : > { %v2648_v27 = vadd.f32 %v2635_v25, %v2620_v41  ;;  %v2647_v42 = vadd.f32 %v2635_v25, %v2619_v53  ;;  %v2628_v55 = vadd.f32 %v2609_v36, %v4967_v20  ;;  %v2627_v50 = vadd.f32 %v2568_v15, %v4969_v22  ;;  %v2611_v10 = vpop.f32.mrb[55].mxu1  ;;  %3754 = vmatprep.subr.msk.bf16.mxu0 %vm605_vm0, %v2677_v31  ;;  %v2900_v43 = vpop.permute.xlu0 %2899 }
 0x339   : > { %v2649_v49 = vadd.f32 %v2635_v25, %v2621_v3  ;;  %v2654_v17 = vadd.f32 %v2640_v28, %v2626_v5  ;;  %v2629_v30 = vadd.f32 %v2611_v10, %v4971_v52  ;;  %3756 = vmatprep.subr.msk.bf16.mxu1 %vm605_vm0, %v2679_v34  ;;  %v2662_v21 = vmax.f32 %v2646_v11, 0.0 }
 0x33a   : > { %v2656_v44 = vadd.f32 %v2640_v28, %v2628_v55  ;;  %v2655_v29 = vadd.f32 %v2640_v28, %v2627_v50  ;;  %v2664_v54 = vmax.f32 %v2648_v27, 0.0  ;;  %v2693_v57 = vsel %vm605_vm0, %v2676_v46, 0 }
 0x33b   : > { %v2670_v8 = vmax.f32 %v2654_v17, 0.0  ;;  %v2657_v38 = vadd.f32 %v2640_v28, %v2629_v30  ;;  %v2663_v26 = vmax.f32 %v2647_v42, 0.0  ;;  %2717 = vmatpush1.bf16.msra.mxu0 %v2693_v57  ;;  %v2699_v33 = vsel %vm605_vm0, %v2678_v60, 0 }
 0x33c   : > { %v2672_v13 = vmax.f32 %v2656_v44, 0.0  ;;  %v2671_v25 = vmax.f32 %v2655_v29, 0.0  ;;  %v2665_v6 = vmax.f32 %v2649_v49, 0.0  ;;  %2760 = vmatpush1.bf16.msra.mxu1 %v2699_v33  ;;  %v2901_v32 = vrot.slane %v2900_v43, 6 }
 0x33d   : > { %v2680_v59 = vpack.c.bf16 %v2670_v8, %v2662_v21  ;;  %v2673_v37 = vmax.f32 %v2657_v38, 0.0 }
 0x33e   : > { %v2682_v40 = vpack.c.bf16 %v2672_v13, %v2664_v54  ;;  %v2681_v12 = vpack.c.bf16 %v2671_v25, %v2663_v26  ;;  %3755 = vmatmul.mubr.msk.bf16.vlgmr.msra.gmra.mrb[56].mxu0 %vm601_vm1, %v3858_v47 }
 0x33f   : > { %v2683_v51 = vpack.c.bf16 %v2673_v37, %v2665_v6  ;;  %v2705_v28 = vsel %vm605_vm0, %v2680_v59, 0  ;;  %3757 = vmatmul.mubr.msk.bf16.vlgmr.msra.gmra.mrb[56].mxu1 %vm601_vm1, %v3858_v47  ;;  %2834 = vmatprep.mubr.bf16.mxu0 %v5390_v58 }
 0x340   : > { %3758 = vmatprep.subr.msk.bf16.mxu0 %vm605_vm0, %v2681_v12  ;;  %v2711_v4 = vsel %vm605_vm0, %v2682_v40, 0  ;;  %2877 = vmatprep.mubr.bf16.mxu1 %v5390_v58 }
 0x341   : > { %3760 = vmatprep.subr.msk.bf16.mxu1 %vm605_vm0, %v2683_v51  ;;  %2803 = vmatpush1.bf16.msra.mxu0 %v2705_v28  ;;  %v5434_v28 = vld [vmem:[#allocation47_spill] sm:$0xff] }
 0x342   : > { %2846 = vmatpush1.bf16.msra.mxu1 %v2711_v4 }
 0x346   : > { %3759 = vmatmul.mubr.msk.bf16.vlgmr.msra.gmra.mrb[60].mxu0 %vm601_vm1, %v3858_v47 }
 0x347   : > { %3761 = vmatmul.mubr.msk.bf16.vlgmr.msra.gmra.mrb[60].mxu1 %vm601_vm1, %v3858_v47  ;;  %3081 = vmatprep.mubr.bf16.mxu0 %v5390_v58 }
 0x348   : > { %3124 = vmatprep.mubr.bf16.mxu1 %v5390_v58 }
 0x411   : > { %v5000_v61 = vpop.f32.mrb[56].mxu0 }
 0x412   : > { %v5002_v0 = vpop.f32.mrb[56].mxu1  ;;  %v5004_v19 = vpop.f32.mrb[57].mxu0 }
 0x413   : > { %v5006_v35 = vpop.f32.mrb[57].mxu1  ;;  %v5008_v56 = vpop.f32.mrb[58].mxu0 }
 0x414   : > { %v2888_v39 = vadd.f32 %v5008_v56, %v4957_v9  ;;  %v5012_v18 = vpop.f32.mrb[58].mxu1  ;;  %v5014_v46 = vpop.f32.mrb[59].mxu0 }
 0x415   : > { %v2890_v48 = vadd.f32 %v5012_v18, %v4959_v7  ;;  %v2889_v1 = vadd.f32 %v5014_v46, %v4961_v62  ;;  %v5020_v63 = vpop.f32.mrb[59].mxu1 }
 0x416   : > { %v2903_v2 = vadd.f32 %v2901_v32, %v2888_v39  ;;  %v2891_v60 = vadd.f32 %v5020_v63, %v4963_v23 }
 0x417   : > { %v2905_v31 = vadd.f32 %v2901_v32, %v2890_v48  ;;  %v2904_v41 = vadd.f32 %v2901_v32, %v2889_v1  ;;  %v5063_v1 = vld [vmem:[%s4731_s25] sm:$0xff] }
 0x418   : > { %v3762_v53 = vmul.f32 -1.442695, %v2903_v2  ;;  %v2906_v9 = vadd.f32 %v2901_v32, %v2891_v60  ;;  %v5067_v60 = vld [vmem:[%s4731_s25 + $0x40] sm:$0x3] }
 0x419   : > { %v3764_v16 = vmul.f32 -1.442695, %v2905_v31  ;;  %v3763_v14 = vmul.f32 -1.442695, %v2904_v41  ;;  %v5024_v34 = vpop.f32.mrb[60].mxu0 }
 0x41a   : > { %3956 = vpow2.f32 %v3762_v53  ;;  %v3765_v11 = vmul.f32 -1.442695, %v2906_v9  ;;  %v5026_v7 = vpop.f32.mrb[60].mxu1  ;;  %v5028_v3 = vpop.f32.mrb[61].mxu0  ;;  %v5073_v53 = vld [vmem:[%s4731_s25 + $0x10] sm:$0xff] }
 0x41b   : > { %3958 = vpow2.f32 %v3764_v16  ;;  %v5030_v62 = vpop.f32.mrb[61].mxu1  ;;  %v5032_v5 = vpop.f32.mrb[62].mxu0  ;;  %v5077_v16 = vld [vmem:[%s4731_s25 + $0x50] sm:$0x3] }
 0x41c   : > { %3960 = vpow2.f32 %v3763_v14  ;;  %v2892_v23 = vadd.f32 %v5032_v5, %v4965_v24  ;;  %v5036_v36 = vpop.f32.mrb[62].mxu1  ;;  %v5038_v15 = vpop.f32.mrb[63].mxu0 }
 0x41d   : > { %3962 = vpow2.f32 %v3765_v11  ;;  %v2894_v27 = vadd.f32 %v5036_v36, %v4967_v20  ;;  %v2893_v42 = vadd.f32 %v5038_v15, %v4969_v22  ;;  %v5044_v55 = vpop.f32.mrb[63].mxu1  ;;  %v5081_v11 = vld [vmem:[%s4731_s25 + $0x8] sm:$0xff] }
 0x41e   : > { %v2907_v50 = vadd.f32 %v2901_v32, %v2892_v23  ;;  %v2895_v10 = vadd.f32 %v5044_v55, %v4971_v52 }
 0x41f   : > { %v2909_v49 = vadd.f32 %v2901_v32, %v2894_v27  ;;  %v2908_v17 = vadd.f32 %v2901_v32, %v2893_v42  ;;  %v5085_v27 = vld [vmem:[%s4731_s25 + $0x48] sm:$0x3] }
 0x420   : > { %v3766_v24 = vmul.f32 -1.442695, %v2907_v50  ;;  %v2910_v30 = vadd.f32 %v2901_v32, %v2895_v10  ;;  %v5089_v10 = vld [vmem:[%s4731_s25 + $0x18] sm:$0xff] }
 0x421   : > { %v3768_v21 = vmul.f32 -1.442695, %v2909_v49  ;;  %v3767_v44 = vmul.f32 -1.442695, %v2908_v17  ;;  %v5093_v17 = vld [vmem:[%s4731_s25 + $0x58] sm:$0x3] }
 0x422   : > { %3964 = vpow2.f32 %v3766_v24  ;;  %v3769_v29 = vmul.f32 -1.442695, %v2910_v30 }
 0x423   : > { %3966 = vpow2.f32 %v3768_v21 }
 0x424   : > { %v3957_v54 = vpop.eup %3956  ;;  %3968 = vpow2.f32 %v3767_v44 }
 0x425   : > { %v3959_v20 = vpop.eup %3958  ;;  %v2935_v8 = vadd.f32 1.0, %v3957_v54  ;;  %3970 = vpow2.f32 %v3769_v29 }
 0x426   : > { %v3961_v22 = vpop.eup %3960  ;;  %v2937_v38 = vadd.f32 1.0, %v3959_v20 }
 0x427   : > { %v3963_v57 = vpop.eup %3962  ;;  %3972 = vrcp.f32 %v2935_v8  ;;  %v2936_v47 = vadd.f32 1.0, %v3961_v22  ;;  %v3859_v22 = vld [vmem:[%s5313_s5 + $0x40] sm:$0xff]  }
 0x428   : > { %3974 = vrcp.f32 %v2937_v38  ;;  %v2938_v52 = vadd.f32 1.0, %v3963_v57 }
 0x429   : > { %3976 = vrcp.f32 %v2936_v47 }
 0x42a   : > { %3978 = vrcp.f32 %v2938_v52 }
 0x42c   : > { %v3965_v26 = vpop.eup %3964 }
 0x42d   : > { %v3967_v13 = vpop.eup %3966  ;;  %v2939_v25 = vadd.f32 1.0, %v3965_v26 }
 0x42e   : > { %v3969_v33 = vpop.eup %3968  ;;  %v2941_v6 = vadd.f32 1.0, %v3967_v13  ;;  %v5118_v13 = vld [vmem:[%s4731_s25 + $0x20] sm:$0xff] }
 0x42f   : > { %v3971_v59 = vpop.eup %3970  ;;  %3980 = vrcp.f32 %v2939_v25  ;;  %v2940_v37 = vadd.f32 1.0, %v3969_v33  ;;  %v5122_v33 = vld [vmem:[%s4731_s25 + $0x60] sm:$0x3] }
 0x430   : > { %3982 = vrcp.f32 %v2941_v6  ;;  %v2942_v40 = vadd.f32 1.0, %v3971_v59 }
 0x431   : > { %v5048_v12 = vpop.eup %3972  ;;  %3984 = vrcp.f32 %v2940_v37  ;;  %v5128_v37 = vld [vmem:[%s4731_s25 + $0x30] sm:$0xff] }
 0x432   : > { %v5050_v51 = vpop.eup %3974  ;;  %3986 = vrcp.f32 %v2942_v40  ;;  %v2962_v4 = vrot.slane %v5048_v12, %v5434_v28 }
 0x433   : > { %v5054_v43 = vpop.eup %3976  ;;  %v2970_v32 = vrot.slane %v5050_v51, %v5434_v28 }
 0x434   : > { %v5058_v39 = vpop.eup %3978  ;;  %v2966_v48 = vrot.slane %v5054_v43, %v5434_v28  ;;  %v2991_v2 = vmul.f32 %v5063_v1, %v2962_v4  ;;  %v2999_v31 = vmul.f32 %v5067_v60, %v2962_v4  ;;  %v5132_v4 = vld [vmem:[%s4731_s25 + $0x70] sm:$0x3] }
 0x435   : > { %v2974_v41 = vrot.slane %v5058_v39, %v5434_v28  ;;  %v2993_v9 = vmul.f32 %v5073_v53, %v2970_v32  ;;  %v3001_v14 = vmul.f32 %v5077_v16, %v2970_v32 }
 0x436   : > { %v2992_v23 = vmul.f32 %v5081_v11, %v2966_v48  ;;  %v3000_v42 = vmul.f32 %v5085_v27, %v2966_v48  ;;  %v3009_v50 = vpack.c.bf16 %v2999_v31, %v2991_v2  ;;  %v5137_v48 = vld [vmem:[%s4731_s25 + $0x28] sm:$0xff] }
 0x437   : > { %v2994_v49 = vmul.f32 %v5089_v10, %v2974_v41  ;;  %v3002_v24 = vmul.f32 %v5093_v17, %v2974_v41  ;;  %v3011_v30 = vpack.c.bf16 %v3001_v14, %v2993_v9  ;;  %v5141_v31 = vld [vmem:[%s4731_s25 + $0x68] sm:$0x3] }
 0x438   : > { %v3010_v21 = vpack.c.bf16 %v3000_v42, %v2992_v23  ;;  %v3026_v44 = vsel %vm605_vm0, %v3009_v50, 0  ;;  %v5150_v23 = vld [vmem:[%s4731_s25 + $0x78] sm:$0x3] }
 0x439   : > { %v5097_v29 = vpop.eup %3980  ;;  %v3012_v54 = vpack.c.bf16 %v3002_v24, %v2994_v49  ;;  %v3032_v20 = vsel %vm605_vm0, %v3011_v30, 0 }
 0x43a   : > { %v5100_v8 = vpop.eup %3982  ;;  %3771 = vmatprep.subr.msk.bf16.mxu0 %vm605_vm0, %v3010_v21  ;;  %v2978_v38 = vrot.slane %v5097_v29, %v5434_v28 }
 0x43b   : > { %v5108_v57 = vpop.eup %3984  ;;  %3773 = vmatprep.subr.msk.bf16.mxu1 %vm605_vm0, %v3012_v54  ;;  %3050 = vmatpush1.bf16.msra.mxu0 %v3026_v44  ;;  %v2986_v47 = vrot.slane %v5100_v8, %v5434_v28 }
 0x43c   : > { %v5113_v52 = vpop.eup %3986  ;;  %3093 = vmatpush1.bf16.msra.mxu1 %v3032_v20  ;;  %v2982_v26 = vrot.slane %v5108_v57, %v5434_v28  ;;  %v2995_v25 = vmul.f32 %v5118_v13, %v2978_v38  ;;  %v3003_v6 = vmul.f32 %v5122_v33, %v2978_v38 }
 0x43d   : > { %v2990_v59 = vrot.slane %v5113_v52, %v5434_v28  ;;  %v2997_v40 = vmul.f32 %v5128_v37, %v2986_v47  ;;  %v3005_v32 = vmul.f32 %v5132_v4, %v2986_v47  ;;  %v5146_v28 = vld [vmem:[%s4731_s25 + $0x38] sm:$0xff]  ;;  %s3791_s25 = sshll.u32 %s4108_s12, 7 }
 0x43e   : > { %3772 = vmatmul.mubr.msk.bf16.vlgmr.msra.gmra.mrb[64].mxu0 %vm601_vm1, %v3859_v22  ;;  %v2996_v2 = vmul.f32 %v5137_v48, %v2982_v26  ;;  %v3004_v41 = vmul.f32 %v5141_v31, %v2982_v26  ;;  %v3013_v9 = vpack.c.bf16 %v3003_v6, %v2995_v25  ;;  %s5165_s20 = scalar_lea.hbm %s5317_s9, %s3791_s25 }
 0x43f   : > { %3774 = vmatmul.mubr.msk.bf16.vlgmr.msra.gmra.mrb[64].mxu1 %vm601_vm1, %v3859_v22  ;;  %v2998_v14 = vmul.f32 %v5146_v28, %v2990_v59  ;;  %v3006_v42 = vmul.f32 %v5150_v23, %v2990_v59  ;;  %v3015_v50 = vpack.c.bf16 %v3005_v32, %v2997_v40  ;;  %3167 = vmatprep.mubr.bf16.mxu0 %v5390_v58 }
 0x440   : > { %v3014_v49 = vpack.c.bf16 %v3004_v41, %v2996_v2  ;;  %v3038_v24 = vsel %vm605_vm0, %v3013_v9, 0  ;;  %3210 = vmatprep.mubr.bf16.mxu1 %v5390_v58 }
 0x441   : > { %v3016_v30 = vpack.c.bf16 %v3006_v42, %v2998_v14  ;;  %v3044_v21 = vsel %vm605_vm0, %v3015_v50, 0 }
 0x442   : > { %3775 = vmatprep.subr.msk.bf16.mxu0 %vm605_vm0, %v3014_v49 }
 0x443   : > { %3777 = vmatprep.subr.msk.bf16.mxu1 %vm605_vm0, %v3016_v30  ;;  %3136 = vmatpush1.bf16.msra.mxu0 %v3038_v24 }
 0x444   : > { %3179 = vmatpush1.bf16.msra.mxu1 %v3044_v21 }
 0x446   : > { %3776 = vmatmul.mubr.msk.bf16.vlgmr.msra.gmra.mrb[68].mxu0 %vm601_vm1, %v3859_v22 }
 0x447   : > { %3778 = vmatmul.mubr.msk.bf16.vlgmr.msra.gmra.mrb[68].mxu1 %vm601_vm1, %v3859_v22 }
 0x448   : > { %4051 = shalt.err (!%p4048_p5)
}
 0x449   : > { %s4052_s12 = scalar_lea.hbm %s5165_s20, 128  ;;  %s4056_s0 = scalar_lea.hbm %s5317_s9, 256 }
 0x44a   : > { %p4053_p6 = scmp.ne.s32.totalorder %s5165_s20, %s4052_s12  ;;  %p4057_p10 = scmp.lt.u32.totalorder %s5165_s20, %s5317_s9 }
 0x44b   : > { %p4058_p11 = scmp.lt.u32.totalorder %s4056_s0, %s4052_s12  ;;  %p4060_p13 = scmp.lt.u32.totalorder %s4052_s12, %s5165_s20 }
 0x44c   : > { %p4054_p7 = pnand %p4053_p6, %p4211_p4 }
 0x44d   : > { %p4059_p12 = por %p4058_p11, %p4057_p10 }
 0x44e   : > { %p4055_p9 = pneg %p4054_p7 }
 0x44f   : > { %p4061_p0 = por %p4060_p13, %p4059_p12 }
 0x451   : > { %p4062_p1 = pnand %p4061_p0, %p4055_p9 }
 0x453   : > { %4065 = shalt.err (!%p4062_p1)
}
 0x454   : > { %3792 = dma.vmem_to_hbm [thread:$0]  (%p4211_p4), %s3433_s23, 128, %s5165_s20, %s3408_s24   ;;  %v3253_v58 = vsub.f32 1.0, %v5048_v12  ;;  %v3255_v54 = vsub.f32 1.0, %v5050_v51  ;;  %v3254_v42 = vsub.f32 1.0, %v5054_v43  ;;  %v5214_v24 = vrot.slane %v5058_v39, %v4777_v45 }
 0x455   : > { %s5238_s25 = scalar_lea.vmem %s5316_s8, %s4238_s28 }
 0x456   : > { %v3264_v59 = vrot.slane %v3253_v58, %v4777_v45 }
 0x458   : > { %v3293_v50 = vmul.f32 %v5063_v1, %v3264_v59 }
 0x511   : > { %v3083_v44 = vpop.f32.mrb[64].mxu0 }
 0x512   : > { %v3221_v20 = vadd.f32 %v3083_v44, %v5000_v61  ;;  %v3126_v22 = vpop.f32.mrb[64].mxu1  ;;  %v3085_v38 = vpop.f32.mrb[65].mxu0  ;;  %v3272_v61 = vrot.slane %v3255_v54, %v4777_v45 }
 0x513   : > { %v3223_v47 = vadd.f32 %v3126_v22, %v5002_v0  ;;  %v3222_v26 = vadd.f32 %v3085_v38, %v5004_v19  ;;  %v3128_v25 = vpop.f32.mrb[65].mxu1  ;;  %v3087_v6 = vpop.f32.mrb[66].mxu0  ;;  %v3301_v22 = vmul.f32 %v5067_v60, %v3264_v59  ;;  %v5232_v60 = vrot.slane %v5097_v29, %v4777_v45 }
 0x514   : > { %3988 = vtanh.f32 %v3221_v20  ;;  %v3224_v40 = vadd.f32 %v3128_v25, %v5006_v35  ;;  %v3229_v32 = vadd.f32 %v3087_v6, %v5008_v56  ;;  %v3130_v2 = vpop.f32.mrb[66].mxu1  ;;  %v3089_v41 = vpop.f32.mrb[67].mxu0  ;;  %v3312_v35 = vrot.slane %v5048_v12, %v4777_v45 }
 0x515   : > { %3990 = vtanh.f32 %v3223_v47  ;;  %v3231_v9 = vadd.f32 %v3130_v2, %v5012_v18  ;;  %v3230_v0 = vadd.f32 %v3089_v41, %v5014_v46  ;;  %v3132_v14 = vpop.f32.mrb[67].mxu1  ;;  %v3256_v56 = vsub.f32 1.0, %v5058_v39 }
 0x516   : > { %3992 = vtanh.f32 %v3222_v26  ;;  %v3232_v19 = vadd.f32 %v3132_v14, %v5020_v63  ;;  %v3295_v49 = vmul.f32 %v5073_v53, %v3272_v61  ;;  %v3320_v18 = vrot.slane %v5050_v51, %v4777_v45 }
 0x517   : > { %3994 = vtanh.f32 %v3224_v40  ;;  %v5210_v63 = vrot.slane %v5054_v43, %v4777_v45  ;;  %v3268_v53 = vrot.slane %v3254_v42, %v4777_v45  ;;  %v3276_v43 = vrot.slane %v3256_v56, %v4777_v45 }
 0x518   : > { %3996 = vtanh.f32 %v3229_v32  ;;  %v3303_v26 = vmul.f32 %v5077_v16, %v3272_v61  ;;  %v3257_v25 = vsub.f32 1.0, %v5097_v29  ;;  %v3258_v32 = vsub.f32 1.0, %v5108_v57 }
 0x519   : > { %3998 = vtanh.f32 %v3231_v9  ;;  %v3169_v46 = vpop.f32.mrb[68].mxu0  ;;  %v3294_v40 = vmul.f32 %v5081_v11, %v3268_v53  ;;  %v3296_v16 = vmul.f32 %v5089_v10, %v3276_v43  ;;  %v3260_v9 = vsub.f32 1.0, %v5113_v52 }
 0x51a   : > { %4000 = vtanh.f32 %v3230_v0  ;;  %v3225_v12 = vadd.f32 %v3169_v46, %v5024_v34  ;;  %v3212_v30 = vpop.f32.mrb[68].mxu1  ;;  %v3171_v1 = vpop.f32.mrb[69].mxu0 }
 0x51b   : > { %4002 = vtanh.f32 %v3232_v19  ;;  %v3227_v51 = vadd.f32 %v3212_v30, %v5026_v7  ;;  %v3226_v21 = vadd.f32 %v3171_v1, %v5028_v3  ;;  %v3214_v58 = vpop.f32.mrb[69].mxu1  ;;  %v3173_v44 = vpop.f32.mrb[70].mxu0  ;;  %v3280_v19 = vrot.slane %v3257_v25, %v4777_v45 }
 0x51c   : > { %4004 = vtanh.f32 %v3225_v12  ;;  %v3228_v39 = vadd.f32 %v3214_v58, %v5030_v62  ;;  %v3233_v54 = vadd.f32 %v3173_v44, %v5032_v5  ;;  %v3216_v20 = vpop.f32.mrb[70].mxu1  ;;  %v3175_v34 = vpop.f32.mrb[71].mxu0 }
 0x51d   : > { %4006 = vtanh.f32 %v3227_v51  ;;  %v3235_v38 = vadd.f32 %v3216_v20, %v5036_v36  ;;  %v3234_v7 = vadd.f32 %v3175_v34, %v5038_v15  ;;  %v3218_v3 = vpop.f32.mrb[71].mxu1  ;;  %v3284_v51 = vrot.slane %v3258_v32, %v4777_v45 }
 0x51e   : > { %v3989_v47 = vpop.eup %3988  ;;  %4008 = vtanh.f32 %v3226_v21  ;;  %v3236_v62 = vadd.f32 %v3218_v3, %v5044_v55  ;;  %v3259_v55 = vsub.f32 1.0, %v5100_v8  ;;  %v3340_v34 = vrot.slane %v5113_v52, %v4777_v45 }
 0x51f   : > { %v3991_v5 = vpop.eup %3990  ;;  %v3341_v6 = vmul.f32 %v3989_v47, %v3312_v35  ;;  %4010 = vtanh.f32 %v3228_v39 }
 0x520   : > { %v3993_v36 = vpop.eup %3992  ;;  %v3343_v15 = vmul.f32 %v3991_v5, %v3320_v18  ;;  %4012 = vtanh.f32 %v3233_v54  ;;  %v3288_v46 = vrot.slane %v3259_v55, %v4777_v45 }
 0x521   : > { %v3995_v59 = vpop.eup %3994  ;;  %v3357_v11 = vadd.f32 %v3341_v6, %v3293_v50  ;;  %v3342_v29 = vmul.f32 %v3993_v36, %v5210_v63  ;;  %4014 = vtanh.f32 %v3235_v38  ;;  %v3306_v36 = vmul.f32 %v5141_v31, %v3284_v51 }
 0x522   : > { %v3997_v2 = vpop.eup %3996  ;;  %v3359_v41 = vadd.f32 %v3343_v15, %v3295_v49  ;;  %v3344_v61 = vmul.f32 %v3995_v59, %v5214_v24  ;;  %4016 = vtanh.f32 %v3234_v7  ;;  %v3302_v49 = vmul.f32 %v5085_v27, %v3268_v53 }
 0x523   : > { %v3999_v10 = vpop.eup %3998  ;;  %3373 = vst [vmem:[%s5238_s25] sm:$0xff] %v3357_v11  ;;  %v3358_v0 = vadd.f32 %v3342_v29, %v3294_v40  ;;  %v3349_v14 = vmul.f32 %v3997_v2, %v3312_v35  ;;  %4018 = vtanh.f32 %v3236_v62  ;;  %v3304_v35 = vmul.f32 %v5093_v17, %v3276_v43 }
 0x524   : > { %v4001_v42 = vpop.eup %4000  ;;  %3375 = vst [vmem:[%s5238_s25 + $0x10] sm:$0xff] %v3359_v41  ;;  %v3360_v56 = vadd.f32 %v3344_v61, %v3296_v16  ;;  %v3351_v50 = vmul.f32 %v3999_v10, %v3320_v18  ;;  %v3336_v27 = vrot.slane %v5100_v8, %v4777_v45  ;;  %v3292_v53 = vrot.slane %v3260_v9, %v4777_v45 }
 0x525   : > { %v4003_v12 = vpop.eup %4002  ;;  %3374 = vst [vmem:[%s5238_s25 + $0x8] sm:$0xff] %v3358_v0  ;;  %v3365_v30 = vadd.f32 %v3349_v14, %v3301_v22  ;;  %v3350_v1 = vmul.f32 %v4001_v42, %v5210_v63  ;;  %v3297_v63 = vmul.f32 %v5118_v13, %v3280_v19  ;;  %v3332_v43 = vrot.slane %v5108_v57, %v4777_v45 }
 0x526   : > { %v4005_v21 = vpop.eup %4004  ;;  %3376 = vst [vmem:[%s5238_s25 + $0x18] sm:$0xff] %v3360_v56  ;;  %v3367_v58 = vadd.f32 %v3351_v50, %v3303_v26  ;;  %v3352_v18 = vmul.f32 %v4003_v12, %v5214_v24  ;;  %v3299_v20 = vmul.f32 %v5128_v37, %v3288_v46  ;;  %v3298_v13 = vmul.f32 %v5137_v48, %v3284_v51 }
 0x527   : > { %v4007_v44 = vpop.eup %4006  ;;  %3381 = vst [vmem:[%s5238_s25 + $0x40] sm:$0x3] %v3365_v30  ;;  %v3366_v39 = vadd.f32 %v3350_v1, %v3302_v49  ;;  %v3345_v17 = vmul.f32 %v4005_v21, %v5232_v60  ;;  %v3300_v47 = vmul.f32 %v5146_v28, %v3292_v53  ;;  %v3305_v45 = vmul.f32 %v5122_v33, %v3280_v19 }
 0x528   : > { %v4009_v54 = vpop.eup %4008  ;;  %3383 = vst [vmem:[%s5238_s25 + $0x50] sm:$0x3] %v3367_v58  ;;  %v3368_v24 = vadd.f32 %v3352_v18, %v3304_v35  ;;  %v3347_v8 = vmul.f32 %v4007_v44, %v3336_v27  ;;  %v3307_v5 = vmul.f32 %v5132_v4, %v3288_v46  ;;  %v3308_v16 = vmul.f32 %v5150_v23, %v3292_v53 }
 0x529   : > { %v4011_v22 = vpop.eup %4010  ;;  %3382 = vst [vmem:[%s5238_s25 + $0x48] sm:$0x3] %v3366_v39  ;;  %v3361_v38 = vadd.f32 %v3345_v17, %v3297_v63  ;;  %v3346_v7 = vmul.f32 %v4009_v54, %v3332_v43 }
 0x52a   : > { %v4013_v3 = vpop.eup %4012  ;;  %3384 = vst [vmem:[%s5238_s25 + $0x58] sm:$0x3] %v3368_v24  ;;  %v3363_v57 = vadd.f32 %v3347_v8, %v3299_v20  ;;  %v3348_v26 = vmul.f32 %v4011_v22, %v3340_v34 }
 0x52b   : > { %v4015_v37 = vpop.eup %4014  ;;  %3377 = vst [vmem:[%s5238_s25 + $0x20] sm:$0xff] %v3361_v38  ;;  %v3362_v25 = vadd.f32 %v3346_v7, %v3298_v13  ;;  %v3353_v52 = vmul.f32 %v4013_v3, %v5232_v60 }
 0x52c   : > { %v4017_v62 = vpop.eup %4016  ;;  %3379 = vst [vmem:[%s5238_s25 + $0x30] sm:$0xff] %v3363_v57  ;;  %v3364_v48 = vadd.f32 %v3348_v26, %v3300_v47  ;;  %v3355_v6 = vmul.f32 %v4015_v37, %v3336_v27 }
 0x52d   : > { %v4019_v28 = vpop.eup %4018  ;;  %3378 = vst [vmem:[%s5238_s25 + $0x28] sm:$0xff] %v3362_v25  ;;  %v3369_v40 = vadd.f32 %v3353_v52, %v3305_v45  ;;  %v3354_v15 = vmul.f32 %v4017_v62, %v3332_v43 }
 0x52e   : > { %3380 = vst [vmem:[%s5238_s25 + $0x38] sm:$0xff] %v3364_v48  ;;  %v3371_v33 = vadd.f32 %v3355_v6, %v3307_v5  ;;  %v3356_v60 = vmul.f32 %v4019_v28, %v3340_v34 }
 0x52f   : > { %3385 = vst [vmem:[%s5238_s25 + $0x60] sm:$0x3] %v3369_v40  ;;  %v3370_v55 = vadd.f32 %v3354_v15, %v3306_v36 }
 0x530   : > { %3387 = vst [vmem:[%s5238_s25 + $0x70] sm:$0x3] %v3371_v33  ;;  %v3372_v59 = vadd.f32 %v3356_v60, %v3308_v16 }
 0x531   : > { %3386 = vst [vmem:[%s5238_s25 + $0x68] sm:$0x3] %v3370_v55 }
 0x532   : > { %3388 = vst [vmem:[%s5238_s25 + $0x78] sm:$0x3] %v3372_v59 }
 0x533 PF: > { %p3798_p4 = scmp.ge.s32.totalorder %s4116_s14, 2  ;;  %s3468_s28 = sand.u32 1, %s4096_s30  }
 0x534   : > { %s3469_s27 = scalar_lea.sflag [#allocation3], %s3468_s28 }
 0x535   : > { %p3795_p2 = pnand %p3798_p4, %p4218_p8 }
 0x537   : > { %4091 = dma.done.wait (!%p3795_p2), %s3469_s27, 128  }
 0x538   : > { %4093 = vsyncadd (!%p3795_p2), %s3469_s27, 4294967168  ;;  %s23_s14 = sadd.s32 1, %s4116_s14   ;;  %s5435_s30 = smov %s4100_s10 }
 0x539   : > { %p20_p3 = scmp.ge.s32.totalorder %s23_s14, 4   ;;  %s5436_s10 = smov %s4104_s11 }
 0x53a   : > { %s5437_s11 = smov %s4224_s22  ;;  %s5438_s12 = smov %s4112_s13 }
 0x53b   : > { %s5439_s13 = smov %s5441_s17  ;;  %22 = sbr.rel (!%p20_p3) target bundleno = 8 (0x8), region = 119 }
 0x542   :  { %3474 = vsyncpa [#allocation3], 1 }
 0x543   :  { %3476 = vsyncpa [#allocation3 + $0x1], 1 }

</bundles_post_ra>
